<compile_context>
chip_gen: v5e
topology: v5e:2x2
jax: 0.10.0
libtpu: 0.0.40
codegen_flags: <defaults>
</compile_context>

<pallas_src>
import functools

import jax
import jax.numpy as jnp
from jax.experimental import pallas as pl
from jax.experimental.pallas import tpu as pltpu

POLY_DEGREES = (2, 3)       # module hard-codes [2, 3]
NUM_POLY_FEATS = 256        # module hard-codes 256
LANE = 128


def _poly_embed_kernel(x_ref, wb_ref, misc_ref, o_ref, *,
                       C, Pt, L, D, R2, NG, FB_ROW, BP_ROW):
    R = C * Pt
    xf = x_ref[...].reshape(R, L)                      # (R, L) f32
    xb = xf.astype(jnp.bfloat16)

    # One fused, lane-aligned bf16 MXU matmul.  Column groups (128 lanes each):
    #   g0: wp_x | g1: wv1@wp_p1 | g2: wv0@wp_p0 | g3: wq1@wk1^T
    #   g4: (wk0@colsum(wq0)) replicated over D columns  (pre-broadcast s0)
    y = jnp.dot(xb, wb_ref[0:L, 0:NG * LANE],
                preferred_element_type=jnp.float32)    # (R, 5*128)
    y_x = y[:, 0 * LANE:1 * LANE]                      # lanes 0:D valid, rest 0
    w1 = y[:, 1 * LANE:2 * LANE]                       # x @ (wv1 @ wp_p1)
    w0 = y[:, 2 * LANE:3 * LANE]                       # x @ (wv0 @ wp_p0)
    m1 = y[:, 3 * LANE:3 * LANE + L]                   # x @ (wq1 @ wk1^T)   (R, L)
    s0 = y[:, 4 * LANE:5 * LANE]                       # degree-2 score, bcast lanes

    # Random Fourier features: frequencies in f32 (phase accuracy), then two
    # accumulated projection dots (no lane-axis sin/cos concat).
    wx = jnp.dot(xf, misc_ref[0:L, :], preferred_element_type=jnp.float32)
    wx = (wx + misc_ref[FB_ROW:FB_ROW + 1, :])[:, 0:R2]              # (R, R2)
    y_rff = (
        jnp.dot(jnp.sin(wx).astype(jnp.bfloat16),
                wb_ref[0:R2, NG * LANE:(NG + 1) * LANE],
                preferred_element_type=jnp.float32)
        + jnp.dot(jnp.cos(wx).astype(jnp.bfloat16),
                  wb_ref[0:R2, (NG + 1) * LANE:(NG + 2) * LANE],
                  preferred_element_type=jnp.float32))               # (R, 128)

    # degree == 2 (x**0 == 1): per-(b, p) feature shared across channels.
    out0 = jnp.sum((s0 * w0).reshape(C, Pt, LANE), axis=0, keepdims=True)

    # degree == 3: tiny per-patch CxC attention on the VPU.  The C^2 temp is
    # bounded per grid step by the (batch, patch-chunk) tiling.
    xc = xf.reshape(C, Pt, L)
    m1c = m1.reshape(C, Pt, L)
    w1c = w1.reshape(C, Pt, LANE)
    attn = jnp.sum(m1c[:, None, :, :] * xc[None, :, :, :],
                   axis=-1, keepdims=True)                           # (C, C, Pt, 1)
    out1 = jnp.sum(attn * w1c[None, :, :, :], axis=1)                # (C, Pt, 128)

    out = (y_x + y_rff).reshape(C, Pt, LANE) + out1 + out0 \
        + misc_ref[BP_ROW:BP_ROW + 1, :].reshape(1, 1, LANE)
    o_ref[...] = out[:, :, 0:D].reshape(1, C, Pt, D).astype(o_ref.dtype)


def _choose_patch_tile(Np, C):
    # Keep all channels per tile (degrees 2/3 couple channels); chunk patches
    # so a tile has O(1K) matmul rows, is a multiple of 8, and divides Np.
    target = max(8, 1024 // max(C, 1))
    if Np <= target or Np % 8 != 0:
        return Np
    best = 8
    for cand in range(8, target + 1, 8):
        if Np % cand == 0:
            best = cand
    return best


def patchtst_poly_embedding(x, params):
    """x: (B, C, Np, L) float32 -> (B, C, Np, d_model) float32."""
    B, C, Np, L = x.shape
    wq, wk, wv = params['wq'], params['wk'], params['wv']
    wf, fb = params['wf'], params['fb']
    wproj, bproj = params['wproj'], params['bproj']
    D = wq.shape[-1]
    F = wv.shape[-1]
    R2 = wf.shape[-1]

    # Projection rows in feature-concat order [x, poly0, poly1, sin, cos].
    wp_x = wproj[:L]
    wp_p0 = wproj[L:L + F]
    wp_p1 = wproj[L + F:L + 2 * F]
    wp_sin = wproj[L + 2 * F:L + 2 * F + R2]
    wp_cos = wproj[L + 2 * F + R2:]

    # Offline algebraic folds.
    wvp0 = wv[0] @ wp_p0                        # (L, D)
    wvp1 = wv[1] @ wp_p1                        # (L, D)
    wqk1 = wq[1] @ wk[1].T                      # (L, L)
    q0 = jnp.sum(wq[0], axis=0)                 # (D,) = ones(L) @ wq0
    wkq0 = wk[0] @ q0                           # (L,)

    NG = 5                                      # fused-matmul groups
    Lw = -(-max(L, R2) // 16) * 16              # bf16 sublane tile = 16 rows

    def pad_block(w):
        r, c = w.shape
        return jnp.pad(w, ((0, Lw - r), (0, LANE - c)))

    # One packed bf16 weight slab: 5 matmul groups + sin/cos projections.
    groups = [wp_x, wvp1, wvp0, wqk1,
              jnp.tile(wkq0.reshape(L, 1), (1, D)),      # s0 pre-broadcast
              wp_sin, wp_cos]
    wb = jnp.concatenate([pad_block(g) for g in groups],
                         axis=1).astype(jnp.bfloat16)    # (Lw, 7*128)

    # One f32 misc slab: wf rows, fb row, bproj row (8-row-aligned offsets).
    fb_row = -(-L // 8) * 8
    bp_row = fb_row + 8
    misc = jnp.zeros((bp_row + 8, LANE), jnp.float32)
    misc = misc.at[:L, :R2].set(wf.astype(jnp.float32))
    misc = misc.at[fb_row, :R2].set(fb.reshape(R2).astype(jnp.float32))
    misc = misc.at[bp_row, :D].set(bproj.astype(jnp.float32))

    Pt = _choose_patch_tile(Np, C)
    grid = (B, Np // Pt)

    kernel = functools.partial(_poly_embed_kernel, C=C, Pt=Pt, L=L, D=D, R2=R2,
                               NG=NG, FB_ROW=fb_row, BP_ROW=bp_row)

    xf = x.astype(jnp.float32)
    out = pl.pallas_call(
        kernel,
        out_shape=jax.ShapeDtypeStruct((B, C, Np, D), jnp.float32),
        grid=grid,
        in_specs=[
            pl.BlockSpec((1, C, Pt, L), lambda b, pj: (b, 0, pj, 0)),
            pl.BlockSpec(wb.shape, lambda b, pj: (0, 0)),      # resident weights
            pl.BlockSpec(misc.shape, lambda b, pj: (0, 0)),    # resident weights
        ],
        out_specs=pl.BlockSpec((1, C, Pt, D), lambda b, pj: (b, 0, pj, 0)),
        compiler_params=pltpu.CompilerParams(
            dimension_semantics=("parallel", "parallel"),
            vmem_limit_bytes=32 * 1024 * 1024),
    )(xf, wb, misc)
    return out


def reference(x, params):
    """Pure-JAX reference mirroring the PyTorch forward exactly."""
    wq, wk, wv = params['wq'], params['wk'], params['wv']
    xt = jnp.swapaxes(x, 1, 2)          # (B, Np, C, L)
    polys = []
    for idx, degree in enumerate(POLY_DEGREES):
        deg = degree - 2
        q = jnp.einsum('bpcl,ld->bpcd', xt ** deg, wq[idx], precision='highest')
        k = jnp.einsum('bpcl,ld->bpcd', xt, wk[idx], precision='highest')
        v = jnp.einsum('bpcl,lf->bpcf', xt, wv[idx], precision='highest')
        a = jnp.einsum('bpcd,bped->bpce', q, k, precision='highest')
        pf = jnp.einsum('bpce,bpef->bpcf', a, v, precision='highest')
        polys.append(jnp.swapaxes(pf, 1, 2))
    polyfeats = jnp.concatenate(polys, axis=-1)
    wx = jnp.einsum('bcpl,lr->bcpr', x, params['wf'],
                    precision='highest') + params['fb'].reshape(1, 1, 1, -1)
    rff = jnp.concatenate([jnp.sin(wx), jnp.cos(wx)], axis=-1)
    feats = jnp.concatenate([x, polyfeats, rff], axis=-1)
    return jnp.einsum('bcpt,td->bcpd', feats, params['wproj'],
                      precision='highest') + params['bproj']


def init_params(key, patch_length, d_model, num_rff, rff_scale=1.0):
    L, D, F, R2 = patch_length, d_model, NUM_POLY_FEATS, num_rff // 2
    total_in = L + num_rff + F * len(POLY_DEGREES)
    ks = jax.random.split(key, 7)
    scale_l = 1.0 / jnp.sqrt(L)
    scale_p = 1.0 / jnp.sqrt(total_in)
    return {
        'wq': jax.random.normal(ks[0], (2, L, D), jnp.float32) * scale_l,
        'wk': jax.random.normal(ks[1], (2, L, D), jnp.float32) * scale_l,
        'wv': jax.random.normal(ks[2], (2, L, F), jnp.float32) * scale_l,
        'wf': rff_scale * jax.random.normal(ks[3], (L, R2), jnp.float32),
        'fb': jax.random.normal(ks[4], (1, 1, 1, R2), jnp.float32),
        'wproj': jax.random.normal(ks[5], (total_in, D), jnp.float32) * scale_p,
        'bproj': jax.random.normal(ks[6], (D,), jnp.float32) * 0.01,
    }


if __name__ == "__main__":
    # small config: batch=2, channels=4, num_patches=8, patch_length=16,
    # d_model=32, num_rff=32 (num_poly_feats fixed at 256 by the module)
    B, C, Np, L = 2, 4, 8, 16
    D, NUM_RFF = 32, 32

    key = jax.random.PRNGKey(0)
    kx, kp = jax.random.split(key)
    x = jax.random.normal(kx, (B, C, Np, L), jnp.float32)
    params = init_params(kp, L, D, NUM_RFF, rff_scale=1.0)

    out = jax.block_until_ready(patchtst_poly_embedding(x, params))
    ref = jax.block_until_ready(reference(x, params))

    assert out.shape == (B, C, Np, D), out.shape
    # bf16 MXU operands + algebraic refolds are not bit-exact; check error
    # relative to the output scale.
    err = float(jnp.max(jnp.abs(out - ref)))
    scale = float(jnp.max(jnp.abs(ref)))
    assert err <= 2e-2 * max(1.0, scale), (err, scale)

    print("KERNEL_OK")
</pallas_src>

<mosaic_0001>
module attributes {stable_mosaic.version = 11 : i64} {
  func.func @_poly_embed_kernel(%arg0: i32, %arg1: i32, %arg2: memref<1x4x8x16xf32, #tpu.memory_space<vmem>>, %arg3: memref<16x896xbf16, #tpu.memory_space<vmem>>, %arg4: memref<32x128xf32, #tpu.memory_space<vmem>>, %arg5: memref<1x4x8x32xf32, #tpu.memory_space<vmem>>) attributes {dimension_semantics = [#tpu.dimension_semantics<parallel>, #tpu.dimension_semantics<parallel>], iteration_bounds = array<i64: 2, 1>, scalar_prefetch = 0 : i64, scratch_operands = 0 : i64, tpu.core_type = #tpu.core_type<tc>, window_params = [{transform_indices = @transform_0, window_bounds = array<i64: 1, 4, 8, 16>}, {pipeline_mode = #tpu.pipeline_mode<synchronous>, transform_indices = @transform_1, window_bounds = array<i64: 16, 896>}, {pipeline_mode = #tpu.pipeline_mode<synchronous>, transform_indices = @transform_2, window_bounds = array<i64: 32, 128>}, {transform_indices = @transform_3, window_bounds = array<i64: 1, 4, 8, 32>}]} {
    %c0 = arith.constant 0 : index
    %c0_0 = arith.constant 0 : index
    %c0_1 = arith.constant 0 : index
    %c0_2 = arith.constant 0 : index
    %0 = vector.load %arg2[%c0, %c0_0, %c0_1, %c0_2] : memref<1x4x8x16xf32, #tpu.memory_space<vmem>>, vector<1x4x8x16xf32>
    %1 = vector.shape_cast %0 : vector<1x4x8x16xf32> to vector<32x16xf32>
    %2 = arith.truncf %1 : vector<32x16xf32> to vector<32x16xbf16>
    %c0_3 = arith.constant 0 : index
    %c0_4 = arith.constant 0 : index
    %3 = vector.load %arg3[%c0_3, %c0_4] : memref<16x896xbf16, #tpu.memory_space<vmem>>, vector<16x640xbf16>
    %cst = arith.constant dense<0.000000e+00> : vector<32x640xf32>
    %4 = tpu.matmul %2, %3, %cst {dimension_numbers = #tpu.dot_dimension_numbers<[1], [0], [0], [1], [0, 0, 1, 1], [], []>} : vector<32x16xbf16>, vector<16x640xbf16>, vector<32x640xf32> -> vector<32x640xf32>
    %5 = vector.extract_strided_slice %4 {offsets = [0, 0], sizes = [32, 128], strides = [1, 1]} : vector<32x640xf32> to vector<32x128xf32>
    %6 = vector.extract_strided_slice %4 {offsets = [0, 128], sizes = [32, 128], strides = [1, 1]} : vector<32x640xf32> to vector<32x128xf32>
    %7 = vector.extract_strided_slice %4 {offsets = [0, 256], sizes = [32, 128], strides = [1, 1]} : vector<32x640xf32> to vector<32x128xf32>
    %8 = vector.extract_strided_slice %4 {offsets = [0, 384], sizes = [32, 16], strides = [1, 1]} : vector<32x640xf32> to vector<32x16xf32>
    %9 = vector.extract_strided_slice %4 {offsets = [0, 512], sizes = [32, 128], strides = [1, 1]} : vector<32x640xf32> to vector<32x128xf32>
    %c0_5 = arith.constant 0 : index
    %c0_6 = arith.constant 0 : index
    %10 = vector.load %arg4[%c0_5, %c0_6] : memref<32x128xf32, #tpu.memory_space<vmem>>, vector<16x128xf32>
    %cst_7 = arith.constant dense<0.000000e+00> : vector<32x128xf32>
    %11 = tpu.matmul %1, %10, %cst_7 {dimension_numbers = #tpu.dot_dimension_numbers<[1], [0], [0], [1], [0, 0, 1, 1], [], []>} : vector<32x16xf32>, vector<16x128xf32>, vector<32x128xf32> -> vector<32x128xf32>
    %c16 = arith.constant 16 : index
    %c0_8 = arith.constant 0 : index
    %12 = vector.load %arg4[%c16, %c0_8] : memref<32x128xf32, #tpu.memory_space<vmem>>, vector<1x128xf32>
    %13 = vector.broadcast %12 : vector<1x128xf32> to vector<32x128xf32>
    %14 = arith.addf %11, %13 : vector<32x128xf32>
    %15 = vector.extract_strided_slice %14 {offsets = [0, 0], sizes = [32, 16], strides = [1, 1]} : vector<32x128xf32> to vector<32x16xf32>
    %16 = math.sin %15 : vector<32x16xf32>
    %17 = arith.truncf %16 : vector<32x16xf32> to vector<32x16xbf16>
    %c0_9 = arith.constant 0 : index
    %c640 = arith.constant 640 : index
    %18 = vector.load %arg3[%c0_9, %c640] : memref<16x896xbf16, #tpu.memory_space<vmem>>, vector<16x128xbf16>
    %cst_10 = arith.constant dense<0.000000e+00> : vector<32x128xf32>
    %19 = tpu.matmul %17, %18, %cst_10 {dimension_numbers = #tpu.dot_dimension_numbers<[1], [0], [0], [1], [0, 0, 1, 1], [], []>} : vector<32x16xbf16>, vector<16x128xbf16>, vector<32x128xf32> -> vector<32x128xf32>
    %20 = math.cos %15 : vector<32x16xf32>
    %21 = arith.truncf %20 : vector<32x16xf32> to vector<32x16xbf16>
    %c0_11 = arith.constant 0 : index
    %c768 = arith.constant 768 : index
    %22 = vector.load %arg3[%c0_11, %c768] : memref<16x896xbf16, #tpu.memory_space<vmem>>, vector<16x128xbf16>
    %cst_12 = arith.constant dense<0.000000e+00> : vector<32x128xf32>
    %23 = tpu.matmul %21, %22, %cst_12 {dimension_numbers = #tpu.dot_dimension_numbers<[1], [0], [0], [1], [0, 0, 1, 1], [], []>} : vector<32x16xbf16>, vector<16x128xbf16>, vector<32x128xf32> -> vector<32x128xf32>
    %24 = arith.addf %19, %23 : vector<32x128xf32>
    %25 = arith.mulf %9, %7 : vector<32x128xf32>
    %26 = vector.shape_cast %25 : vector<32x128xf32> to vector<4x8x128xf32>
    %cst_13 = arith.constant dense<0.000000e+00> : vector<8x128xf32>
    %27 = vector.multi_reduction <add>, %26, %cst_13 [0] : vector<4x8x128xf32> to vector<8x128xf32>
    %28 = vector.shape_cast %27 : vector<8x128xf32> to vector<1x8x128xf32>
    %29 = vector.shape_cast %1 : vector<32x16xf32> to vector<4x8x16xf32>
    %30 = vector.shape_cast %8 : vector<32x16xf32> to vector<4x8x16xf32>
    %31 = vector.shape_cast %6 : vector<32x128xf32> to vector<4x8x128xf32>
    %32 = vector.shape_cast %30 : vector<4x8x16xf32> to vector<4x1x8x16xf32>
    %33 = vector.shape_cast %29 : vector<4x8x16xf32> to vector<1x4x8x16xf32>
    %34 = vector.broadcast %32 : vector<4x1x8x16xf32> to vector<4x4x8x16xf32>
    %35 = vector.broadcast %33 : vector<1x4x8x16xf32> to vector<4x4x8x16xf32>
    %36 = arith.mulf %34, %35 : vector<4x4x8x16xf32>
    %cst_14 = arith.constant dense<0.000000e+00> : vector<4x4x8xf32>
    %37 = vector.multi_reduction <add>, %36, %cst_14 [3] : vector<4x4x8x16xf32> to vector<4x4x8xf32>
    %38 = vector.shape_cast %37 : vector<4x4x8xf32> to vector<4x4x8x1xf32>
    %39 = vector.shape_cast %31 : vector<4x8x128xf32> to vector<1x4x8x128xf32>
    %40 = vector.broadcast %38 : vector<4x4x8x1xf32> to vector<4x4x8x128xf32>
    %41 = vector.broadcast %39 : vector<1x4x8x128xf32> to vector<4x4x8x128xf32>
    %42 = arith.mulf %40, %41 : vector<4x4x8x128xf32>
    %cst_15 = arith.constant dense<0.000000e+00> : vector<4x8x128xf32>
    %43 = vector.multi_reduction <add>, %42, %cst_15 [1] : vector<4x4x8x128xf32> to vector<4x8x128xf32>
    %44 = arith.addf %5, %24 : vector<32x128xf32>
    %45 = vector.shape_cast %44 : vector<32x128xf32> to vector<4x8x128xf32>
    %46 = arith.addf %45, %43 : vector<4x8x128xf32>
    %47 = vector.broadcast %28 : vector<1x8x128xf32> to vector<4x8x128xf32>
    %48 = arith.addf %46, %47 : vector<4x8x128xf32>
    %c24 = arith.constant 24 : index
    %c0_16 = arith.constant 0 : index
    %49 = vector.load %arg4[%c24, %c0_16] : memref<32x128xf32, #tpu.memory_space<vmem>>, vector<1x128xf32>
    %50 = vector.shape_cast %49 : vector<1x128xf32> to vector<1x1x128xf32>
    %51 = vector.broadcast %50 : vector<1x1x128xf32> to vector<4x8x128xf32>
    %52 = arith.addf %48, %51 : vector<4x8x128xf32>
    %53 = vector.extract_strided_slice %52 {offsets = [0, 0, 0], sizes = [4, 8, 32], strides = [1, 1, 1]} : vector<4x8x128xf32> to vector<4x8x32xf32>
    %54 = vector.shape_cast %53 : vector<4x8x32xf32> to vector<1x4x8x32xf32>
    %c0_17 = arith.constant 0 : index
    %c0_18 = arith.constant 0 : index
    %c0_19 = arith.constant 0 : index
    %c0_20 = arith.constant 0 : index
    %55 = vector.load %arg5[%c0_17, %c0_18, %c0_19, %c0_20] : memref<1x4x8x32xf32, #tpu.memory_space<vmem>>, vector<1x4x8x32xf32>
    tpu.vector_store %arg5[%c0_17, %c0_18, %c0_19, %c0_20], %54 {strides = array<i32>} : memref<1x4x8x32xf32, #tpu.memory_space<vmem>>, vector<1x4x8x32xf32>,
    return
  }
  func.func @transform_0(%arg0: i32, %arg1: i32) -> (i32, i32, i32, i32) {
    %c0_i32 = arith.constant 0 : i32
    %c0_i32_0 = arith.constant 0 : i32
    %c0_i32_1 = arith.constant 0 : i32
    return %arg0, %c0_i32, %arg1, %c0_i32_0 : i32, i32, i32, i32
  }
  func.func @transform_1(%arg0: i32, %arg1: i32) -> (i32, i32) {
    %c0_i32 = arith.constant 0 : i32
    %c0_i32_0 = arith.constant 0 : i32
    %c0_i32_1 = arith.constant 0 : i32
    return %c0_i32, %c0_i32_0 : i32, i32
  }
  func.func @transform_2(%arg0: i32, %arg1: i32) -> (i32, i32) {
    %c0_i32 = arith.constant 0 : i32
    %c0_i32_0 = arith.constant 0 : i32
    %c0_i32_1 = arith.constant 0 : i32
    return %c0_i32, %c0_i32_0 : i32, i32
  }
  func.func @transform_3(%arg0: i32, %arg1: i32) -> (i32, i32, i32, i32) {
    %c0_i32 = arith.constant 0 : i32
    %c0_i32_0 = arith.constant 0 : i32
    %c0_i32_1 = arith.constant 0 : i32
    return %arg0, %c0_i32, %arg1, %c0_i32_0 : i32, i32, i32, i32
  }
}

</mosaic_0001>

<bundles_post_ra>
// kernel: tpu_custom_call.1
= control target key start
LH: loop header
LB: loop body
LE: loop exit
PB: predicated region body
PF: predicated region fallthrough
CT: control target
= control target key end

     0   :  { %8 = vsyncpa [#allocation3], 0  ;;  %s3096_s0 = inlined_call_operand.hbm [shape: f32[2,4,8,16], index: 0, kind: input, shape index: {}]   ;;  %s3097_s1 = inlined_call_operand.hbm [shape: bf16[16,896], index: 1, kind: input, shape index: {}]   ;;  %s3098_s2 = inlined_call_operand.hbm [shape: f32[32,128], index: 2, kind: input, shape index: {}]   ;;  %s3099_s3 = inlined_call_operand.hbm [shape: f32[2,4,8,32], index: 3, kind: output, shape index: {}]  }
   0x1   :  { %10 = vsyncpa [#allocation3 + $0x1], 0 }
   0x2   :  { %11 = vsyncpa [#allocation6], 0 }
   0x3   :  { %12 = vsyncpa [#allocation4], 0 }
   0x4   :  { %14 = vsyncpa [#allocation4 + $0x1], 0  ;;  %s2385_s12 = smov 0   ;;  %s2387_s13 = smov 0  }
   0x5   :  { %s2389_s14 = smov 0   ;;  %s2391_s15 = smov 0  }
   0x6   :  { %s2393_s16 = smov 0   ;;  %s2395_s17 = smov 0  }
   0x7 LB: > { %s1976_s18 = sadd.s32 4294967295, %s2348_s17   ;;  %s1977_s19 = sadd.s32 4294967294, %s2348_s17   ;;  %s2348_s17 = sphi %s2395_s17, %s20_s17   ;;  %s2344_s16 = sphi %s2393_s16, %s3117_s16   ;;  %s2340_s15 = sphi %s2391_s15, %s3116_s15   ;;  %s2336_s14 = sphi %s2389_s14, %s3115_s14   ;;  %s2332_s13 = sphi %s2387_s13, %s3114_s13   ;;  %s2328_s12 = sphi %s2385_s12, %s3113_s12  }
   0x8   : > { %p54_p0 = scmp.ne.s32.totalorder %s2332_s13, %s2328_s12  ;;  %p2421_p1 = scmp.eq.s32.totalorder %s1976_s18, 0 }
   0x9   : > { %p128_p2 = scmp.eq.s32.totalorder %s1977_s19, 1  ;;  %p1978_p4 = scmp.ge.s32.totalorder %s2348_s17, 1 }
   0xa   : > { %p2427_p3 = por %p2421_p1, %p54_p0  ;;  %p135_p6 = scmp.lt.s32.totalorder %s2348_s17, 3 }
   0xb   : > { %p2432_p5 = por %p128_p2, %p54_p0  ;;  %s146_s25 = sshll.u32 %s3097_s1, 4  ;;  %s147_s25 = int_to_ptr.hbm [resolvable:$true] %s146_s25 }
   0xc   : > { %p2440_p7 = pnand %p1978_p4, %p135_p6  ;;  %s2350_s27 = smov [#allocation5]  }
   0xd   : > { %s148_s28 = sshll.u32 %s2350_s27, 4  ;;  %p1981_p10 = scmp.ge.s32.totalorder %s2348_s17, 2  ;;  %s149_s28 = int_to_ptr.vmem [resolvable:$true] %s148_s28 }
   0xe   : > { %p2086_p8 = pneg %p2440_p7  ;;  %s160_s4 = sshll.u32 %s3098_s2, 4  ;;  %s161_s4 = int_to_ptr.hbm [resolvable:$true] %s160_s4 }
   0xf   : > { %s2351_s5 = smov 448   ;;  %s2352_s6 = smov 28  }
  0x10   : > { %p2087_p9 = pnand %p2086_p8, %p2421_p1  ;;  %s2353_s7 = smov [#allocation7]  }
  0x11   : > { %s162_s8 = sshll.u32 %s2353_s7, 4  ;;  %s2354_s9 = smov 128   ;;  %s163_s8 = int_to_ptr.vmem [resolvable:$true] %s162_s8 }
  0x12   : > { %2089 = dma.hbm_to_vmem [thread:$0]  (!%p2087_p9), %s147_s25, 896, %s149_s28, [#allocation6], %s2351_s5, %s2351_s5, %s2352_s6  }
  0x13   : > { %s2355_s10 = smov 8   ;;  %p122_p11 = scmp.eq.s32.totalorder %s1976_s18, 1 }
  0x14   : > { %2092 = dma.hbm_to_vmem [thread:$0]  (!%p2087_p9), %s161_s4, 512, %s163_s8, [#allocation6], %s2354_s9, %s2354_s9, %s2355_s10  }
  0x15   : > { %s32_s11 = sadd.s32 1, %s2344_s16  ;;  %s41_s19 = sadd.s32 1, %s2336_s14 }
  0x16   : > { %p34_p12 = scmp.ge.s32.totalorder %s32_s11, 2  ;;  %p48_p13 = scmp.ne.s32.totalorder %s2336_s14, %s2332_s13 }
  0x17   : > { %p49_p0 = scmp.eq.s32.totalorder %s2348_s17, 0  ;;  %p2103_p4 = scmp.lt.s32.totalorder %s2348_s17, 2 }
  0x18   : > { %s3119_s11 = smov (%p34_p12, %s32_s11), 0  ;;  %p2464_p2 = por %p122_p11, %p48_p13 }
  0x19   : > { %s36_s24 = ssub.s32 %s2344_s16, %s3119_s11  ;;  %s176_s25 = sand.u32 1, %s2336_s14  }
  0x1a   : > { %p39_p6 = scmp.eq.s32.totalorder %s36_s24, 0  ;;  %p50_p8 = por %p49_p0, %p48_p13 }
  0x1b   : > { %s1982_s27 = sshll.u32 %s176_s25, 5  ;;  %s2065_s18 = sshll.u32 %s2344_s16, 5 }
  0x1c   : > { %s2474_s28 = scalar_select %p39_p6, %s2336_s14, %s41_s19  }
  0x1d   : > { %s186_s4 = scalar_lea.hbm %s3096_s0, %s2065_s18  ;;  %s180_s6 = scalar_lea.vmem [#allocation2], %s1982_s27 }
  0x1e   : > { %s187_s5 = sshll.u32 %s186_s4, 4  ;;  %s189_s7 = sshll.u32 %s180_s6, 4  ;;  %s188_s5 = int_to_ptr.hbm [resolvable:$true] %s187_s5  ;;  %s190_s7 = int_to_ptr.vmem [resolvable:$true] %s189_s7 }
  0x1f   : > { %p2094_p9 = pnand %p2103_p4, %p50_p8  ;;  %s177_s8 = scalar_lea.sflag [#allocation3], %s176_s25 }
  0x20   : > { %201 = sbr.rel (%p2440_p7) target bundleno = 545 (0x221), region = 32  ;;  %s2487_s19 = sand.u32 (!%p2440_p7), 1, %s2332_s13  }
  0x21   : > { %2096 = dma.hbm_to_vmem [thread:$0]  (!%p2094_p9), %s188_s5, 512, %s190_s7, %s177_s8, %s2354_s9, %s2354_s9, %s2355_s10  }
  0x22   : > { %s1986_s24 = sshll.u32 (!%p2440_p7), %s2487_s19, 5  ;;  %s204_s27 = scalar_lea.sflag (!%p2440_p7), [#allocation3], %s2487_s19 }
  0x23   : > { %s207_s18 = scalar_lea.vmem (!%p2440_p7), [#allocation2], %s1986_s24 }
  0x25   : > { %2315 = dma.done.wait (%p2427_p3), %s204_s27, 512  }
  0x26   : > { %2317 = vsyncadd (%p2427_p3), %s204_s27, 4294966784 }
  0x27   : > { %2319 = dma.done.wait (%p2421_p1), [#allocation6], 1408  }
  0x28   : > { %2321 = vsyncadd (%p2421_p1), [#allocation6], 4294965888  ;;  %v2066_v0 = vld [vmem:[#allocation5 + $0x4] sm:$0xf]  ;;  %v1994_v1 = vld [vmem:[#allocation5 + $0x1c] sm:$0xf0] }
  0x29   : > { %v2067_v2 = vld [vmem:[#allocation5 + $0xc] sm:$0xf]  ;;  %v1997_v3 = vor.u32 %v2066_v0, %v1994_v1  ;;  %v2002_v4 = vld [vmem:[#allocation5 + $0x24] sm:$0xf0]  ;;  %v2501_v5 = vld [vmem:[%s207_s18] sm:$0xff]  ;;  %vm280_vm0 = vcmask 130048  }
  0x2a   : > { %v2503_v6 = vld [vmem:[%s207_s18 + $0x8] sm:$0xff]  ;;  %v2005_v7 = vor.u32 %v2067_v2, %v2002_v4  ;;  %v383_v9 = vld [vmem:[#allocation7 + $0x8] sm:$0xff]  ;;  %v382_v10 = vld [vmem:[#allocation7] sm:$0xff]  ;;  %s3037_s20 = scalar_lea.vmem [#allocation8], %s1986_s24  ;;  %s2073_s21 = sshll.u32 %s2340_s15, 5 }
  0x2b   : > { %v2507_v8 = vpack.c.bf16 %v2503_v6, %v2501_v5  ;;  %313 = vmatpush.bf16.msra.mxu1 %v1997_v3  ;;  %v244_v11 = vld [vmem:[%s207_s18 + $0x10] sm:$0xff]  ;;  %v2513_v12 = vld [vmem:[%s207_s18 + $0x18] sm:$0xff]  ;;  %v2559_v37 = vld [vmem:[#allocation7 + $0x10] ss:$0 sm:$0xff]  ;;  %s1868_s10 = scalar_lea.hbm %s3099_s3, %s2073_s21  ;;  %s1869_s25 = sshll.u32 %s3037_s20, 4  ;;  %s1870_s25 = int_to_ptr.vmem [resolvable:$true] %s1869_s25 }
  0x2c   : > { %351 = vmatpush.bf16.msra.mxu3 %v2005_v7  ;;  %v2516_v13 = vpack.c.bf16 %v2513_v12, %v244_v11  ;;  %s1871_s15 = sshll.u32 %s1868_s10, 4  ;;  %s1856_s29 = scalar_lea.sflag [#allocation4], %s2487_s19  ;;  %s1872_s15 = int_to_ptr.hbm [resolvable:$true] %s1871_s15 }
  0x2d   : > { %s2276_s30 = sshra.s32 %s1872_s15, 4  ;;  %s2282_s7 = scalar_lea.hbm %s3099_s3, 64  ;;  %s2277_s30 = int_to_ptr.hbm [resolvable:$true] %s2276_s30 }
  0x2e   : > { %2012 = vmatmul.msk.bf16.vlgmr.msra.gmra.mxu1 %vm280_vm0, %v2507_v8  ;;  %s2278_s4 = scalar_lea.hbm %s2277_s30, 32  ;;  %p2283_p11 = scmp.lt.s32.totalorder %s2277_s30, %s3099_s3 }
  0x2f   : > { %412 = vmatpush.msrb.mxu1 %v383_v9  ;;  %2016 = vmatmul.msk.bf16.vlgmr.msra.gmra.mxu3 %vm280_vm0, %v2507_v8  ;;  %v2357_v9 = vmov 2475754826   ;;  %p2279_p1 = scmp.ne.s32.totalorder %s2277_s30, %s2278_s4  ;;  %p2284_p12 = scmp.lt.s32.totalorder %s2282_s7, %s2278_s4 }
  0x31   : > { %413 = vmatpush.msrb.mxu1 %v382_v10  ;;  %p2280_p3 = pnand %p2279_p1, %p2464_p2  ;;  %p2285_p13 = por %p2284_p12, %p2283_p11 }
  0x33   : > { %p2281_p7 = pneg %p2280_p3 }
  0x35   : > { %p2286_p0 = pnand %p2285_p13, %p2281_p7 }
  0x3e   : > { %2013 = vmatmul.msk.bf16.gmra.mxu1 %vm280_vm0, %v2516_v13 }
  0x3f   : > { %2017 = vmatmul.msk.bf16.gmra.mxu3 %vm280_vm0, %v2516_v13 }
  0x4e   : > { %2020 = vmatmul.msk.f32.vlgmr.msrb.gmra.mxu1 %vm280_vm0, %v2501_v5 }
  0x56   : > { %2021 = vmatmul.msk.f32.gmra.mxu1 %vm280_vm0, %v2503_v6 }
  0x5e   : > { %2022 = vmatmul.msk.f32.gmra.mxu1 %vm280_vm0, %v244_v11 }
  0x66   : > { %2023 = vmatmul.msk.f32.gmra.mxu1 %vm280_vm0, %v2513_v12 }
  0xab   : > { %v2529_v14 = vpop.f32.mrf.mxu1 }
  0xb2   : > { %v353_v15 = vpop.f32.mrf.mxu3 }
  0xb3   : > { %v2531_v16 = vpop.f32.mrf.mxu1  ;;  %v1742_v17 = vmul.f32 %v353_v15, %v244_v11  ;;  %v1740_v18 = vmul.f32 %v353_v15, %v2501_v5  ;;  %v1741_v21 = vmul.f32 %v353_v15, %v2503_v6  ;;  %v1743_v27 = vmul.f32 %v353_v15, %v2513_v12 }
  0xb5   : > { %v1762_v19 = vsel %vm280_vm0, %v1742_v17, 0.0  ;;  %v1756_v20 = vsel %vm280_vm0, %v1740_v18, 0.0  ;;  %v1759_v24 = vsel %vm280_vm0, %v1741_v21, 0.0  ;;  %v1765_v31 = vsel %vm280_vm0, %v1743_v27, 0.0 }
  0xb6   : > { %1763 = vadd.xlane.f32.xlu2 %v1762_v19  ;;  %1757 = vadd.xlane.f32.xlu0 %v1756_v20  ;;  %v2359_v17 = vmov 2102212464   ;;  %v2361_v27 = vmov 1326507024  }
  0xba   : > { %v2537_v22 = vpop.f32.mrf.mxu3 }
  0xbb   : > { %v2539_v23 = vpop.f32.mrf.mxu1  ;;  %v1744_v25 = vmul.f32 %v2537_v22, %v2501_v5  ;;  %v1745_v28 = vmul.f32 %v2537_v22, %v2503_v6  ;;  %v1746_v35 = vmul.f32 %v2537_v22, %v244_v11 }
  0xbd   : > { %v1768_v26 = vsel %vm280_vm0, %v1744_v25, 0.0  ;;  %v1771_v32 = vsel %vm280_vm0, %v1745_v28, 0.0  ;;  %v1774_v40 = vsel %vm280_vm0, %v1746_v35, 0.0 }
  0xbe   : > { %1760 = vadd.xlane.f32.xlu0 %v1759_v24  ;;  %1769 = vadd.xlane.f32.xlu1 %v1768_v26  ;;  %v2360_v24 = vmov 920167782  }
  0xc2   : > { %v2548_v29 = vpop.f32.mrf.mxu3 }
  0xc3   : > { %v2550_v30 = vpop.f32.mrf.mxu1  ;;  %v1748_v33 = vmul.f32 %v2548_v29, %v2501_v5  ;;  %v1750_v36 = vmul.f32 %v2548_v29, %v244_v11  ;;  %v1749_v38 = vmul.f32 %v2548_v29, %v2503_v6 }
  0xc5   : > { %v1780_v34 = vsel %vm280_vm0, %v1748_v33, 0.0  ;;  %v1786_v41 = vsel %vm280_vm0, %v1750_v36, 0.0  ;;  %v1783_v43 = vsel %vm280_vm0, %v1749_v38, 0.0 }
  0xc6   : > { %1766 = vadd.xlane.f32.xlu0 %v1765_v31  ;;  %1772 = vadd.xlane.f32.xlu1 %v1771_v32 }
  0xc7   : > { %1781 = vadd.xlane.f32.xlu2 %v1780_v34 }
  0xca   : > { %v2569_v44 = vpop.f32.mrf.mxu3 }
  0xcb   : > { %v415_v39 = vpop.f32.mrf.mxu1  ;;  %v1753_v47 = vmul.f32 %v2569_v44, %v2503_v6  ;;  %v1752_v48 = vmul.f32 %v2569_v44, %v2501_v5  ;;  %v1754_v51 = vmul.f32 %v2569_v44, %v244_v11  ;;  %v2356_v6 = vmov 683565275  }
  0xcc   : > { %v2566_v42 = vadd.f32 %v2559_v37, %v415_v39  ;;  %v2358_v11 = vmov 2131351028  }
  0xcd   : > { %v1795_v55 = vsel %vm280_vm0, %v1753_v47, 0.0  ;;  %v1792_v56 = vsel %vm280_vm0, %v1752_v48, 0.0  ;;  %v1798_v59 = vsel %vm280_vm0, %v1754_v51, 0.0 }
  0xce   : > { %v427_v45 = vand.u32 2147483647, %v2566_v42  ;;  %v430_v46 = vand.u32 2139095040, %v2566_v42  ;;  %1775 = vadd.xlane.f32.xlu0 %v1774_v40  ;;  %1787 = vadd.xlane.f32.xlu1 %v1786_v41 }
  0xcf   : > { %1784 = vadd.xlane.f32.xlu2 %v1783_v43 }
  0xd0   : > { %v431_v49 = vshrl.u32 %v430_v46, 23  ;;  %v434_v50 = vand.u32 8388607, %v427_v45 }
  0xd2   : > { %v2024_v52 = vadd.s32 4294967169, %v431_v49  ;;  %v435_v53 = vor.u32 8388608, %v434_v50 }
  0xd3   : > { %v418_v54 = vpop.f32.mrf.mxu1 }
  0xd4   : > { %v437_v57 = vadd.s32 1, %v2024_v52  ;;  %v2583_v58 = vadd.f32 %v2559_v37, %v418_v54  ;;  %v2586_v60 = vshll.u32 %v435_v53, 8 }
  0xd6   : > { %vm438_vm1 = vcmp.gt.s32.totalorder %v437_v57, 0  ;;  %v582_v61 = vand.u32 2147483647, %v2583_v58  ;;  %1796 = vadd.xlane.f32.xlu1 %v1795_v55  ;;  %1793 = vadd.xlane.f32.xlu0 %v1792_v56  ;;  %v585_v63 = vand.u32 2139095040, %v2583_v58  ;;  %v476_v3 = vand.u32 65535, %v2586_v60 }
  0xd7   : > { %v439_v62 = vsel %vm438_vm1, %v437_v57, 0  ;;  %1799 = vadd.xlane.f32.xlu2 %v1798_v59  ;;  %v477_v55 = vshrl.u32 %v2586_v60, 16 }
  0xd8   : > { %v441_v0 = vand.u32 31, %v439_v62  ;;  %v440_v1 = vshrl.u32 %v439_v62, 5  ;;  %v586_v4 = vshrl.u32 %v585_v63, 23  ;;  %v589_v5 = vand.u32 8388607, %v582_v61 }
  0xda   : > { %v442_v2 = vsub.s32 32, %v441_v0  ;;  %v444_v7 = vshll.u32 %v2356_v6, %v441_v0  ;;  %v447_v10 = vshll.u32 %v2357_v9, %v441_v0  ;;  %v450_v15 = vshll.u32 %v2358_v11, %v441_v0 }
  0xdb   : > { %v453_v18 = vshll.u32 %v2359_v17, %v441_v0  ;;  %v456_v25 = vshll.u32 %v2360_v24, %v441_v0  ;;  %vm459_vm2 = vcmp.lt.s32.totalorder %v440_v1, 1  ;;  %vm460_vm3 = vcmp.lt.s32.totalorder %v440_v1, 2 }
  0xdc   : > { %v445_v19 = vshrl.u32 %v2357_v9, %v442_v2  ;;  %v448_v20 = vshrl.u32 %v2358_v11, %v442_v2  ;;  %v451_v21 = vshrl.u32 %v2359_v17, %v442_v2  ;;  %v454_v26 = vshrl.u32 %v2360_v24, %v442_v2 }
  0xdd   : > { %v457_v28 = vshrl.u32 %v2361_v27, %v442_v2  ;;  %v2027_v34 = vadd.s32 4294967169, %v586_v4  ;;  %v443_v35 = vshrl.u32 %v2356_v6, %v442_v2  ;;  %vm462_vm4 = vcmp.lt.s32.totalorder %v440_v1, 4 }
  0xde   : > { %v446_v31 = vor.u32 %v445_v19, %v444_v7  ;;  %v449_v32 = vor.u32 %v448_v20, %v447_v10  ;;  %v452_v33 = vor.u32 %v451_v21, %v450_v15  ;;  %v455_v36 = vor.u32 %v454_v26, %v453_v18 }
  0xdf   : > { %v458_v38 = vor.u32 %v457_v28, %v456_v25  ;;  %vm461_vm5 = vcmp.lt.s32.totalorder %v440_v1, 3  ;;  %v590_v47 = vor.u32 8388608, %v589_v5  ;;  %v592_v48 = vadd.s32 1, %v2027_v34 }
  0xe0   : > { %v464_v39 = vsel %vm462_vm4, %v452_v33, 2102212464  ;;  %v467_v40 = vsel %vm459_vm2, %v446_v31, %v449_v32  ;;  %v471_v41 = vsel %vm459_vm2, %v449_v32, %v452_v33  ;;  %v468_v43 = vsel %vm462_vm4, %v455_v36, 920167782 }
  0xe1   : > { %v472_v46 = vsel %vm462_vm4, %v458_v38, 1326507024  ;;  %v463_v49 = vsel %vm459_vm2, %v443_v35, %v446_v31  ;;  %v465_v50 = vsel %vm461_vm5, %v449_v32, %v464_v39  ;;  %v469_v51 = vsel %vm461_vm5, %v452_v33, %v468_v43 }
  0xe2   : > { %v473_v52 = vsel %vm461_vm5, %v455_v36, %v472_v46  ;;  %v470_v53 = vsel %vm460_vm3, %v467_v40, %v469_v51  ;;  %vm593_vm6 = vcmp.gt.s32.totalorder %v592_v48, 0  ;;  %v2611_v63 = vsel %vm460_vm3, %v463_v49, %v465_v50 }
  0xe3   : > { %v474_v54 = vsel %vm460_vm3, %v471_v41, %v473_v52  ;;  %v500_v59 = vand.u32 65535, %v470_v53  ;;  %v501_v62 = vshrl.u32 %v470_v53, 16  ;;  %v594_v4 = vsel %vm593_vm6, %v592_v48, 0 }
  0xe4   : > { %v478_v56 = vand.u32 65535, %v474_v54  ;;  %v479_v57 = vshrl.u32 %v474_v54, 16  ;;  %v2613_v5 = vshll.u32 %v590_v47, 8  ;;  %v596_v34 = vand.u32 31, %v594_v4 }
  0xe5   : > { %v503_v15 = vmul.u32 %v501_v62, %v476_v3  ;;  %v504_v18 = vmul.u32 %v500_v59, %v477_v55  ;;  %v502_v21 = vmul.u32 %v500_v59, %v476_v3  ;;  %v505_v25 = vmul.u32 %v501_v62, %v477_v55 }
  0xe6   : > { %v481_v0 = vmul.u32 %v479_v57, %v476_v3  ;;  %v482_v2 = vmul.u32 %v478_v56, %v477_v55  ;;  %v480_v7 = vmul.u32 %v478_v56, %v476_v3  ;;  %v483_v10 = vmul.u32 %v479_v57, %v477_v55 }
  0xe7   : > { %v506_v31 = vshll.u32 %v503_v15, 16  ;;  %v507_v32 = vshrl.u32 %v503_v15, 16  ;;  %v508_v33 = vshll.u32 %v504_v18, 16  ;;  %v2362_v35 = vmov 0  }
  0xe8   : > { %v484_v19 = vshll.u32 %v481_v0, 16  ;;  %v485_v20 = vshrl.u32 %v481_v0, 16  ;;  %v486_v26 = vshll.u32 %v482_v2, 16  ;;  %v487_v28 = vshrl.u32 %v482_v2, 16  ;;  %v421_v0 = vpop.f32.mrf.mxu1 }
  0xe9   : > { %v509_v38 = vshrl.u32 %v504_v18, 16  ;;  %vm510_vm8 = vc.u32 %v502_v21, %v506_v31  ;;  %v512_v39 = vadd.s32 %v506_v31, %v502_v21  ;;  %v597_v3 = vsub.s32 32, %v596_v34 }
  0xea   : > { %vm488_vm7 = vc.u32 %v480_v7, %v484_v19  ;;  %v490_v1 = vadd.s32 %v484_v19, %v480_v7  ;;  %v511_v41 = vsel %vm510_vm8, 1, %v2362_v35  ;;  %v2618_v47 = vshrl.u32 %v594_v4, 5 }
  0xeb   : > { %v489_v36 = vsel %vm488_vm7, 1, %v2362_v35  ;;  %v513_v46 = vadd.s32 %v511_v41, %v505_v25  ;;  %vm514_vm10 = vc.u32 %v512_v39, %v508_v33  ;;  %v2621_v50 = vadd.s32 %v512_v39, %v508_v33 }
  0xec   : > { %v491_v40 = vadd.s32 %v489_v36, %v483_v10  ;;  %vm492_vm9 = vc.u32 %v490_v1, %v486_v26  ;;  %v515_v49 = vsel %vm514_vm10, 1, %v2362_v35  ;;  %v599_v51 = vshll.u32 %v2356_v6, %v596_v34 }
  0xed   : > { %v493_v43 = vsel %vm492_vm9, 1, %v2362_v35  ;;  %v517_v52 = vadd.s32 %v515_v49, %v513_v46  ;;  %v600_v53 = vshrl.u32 %v2357_v9, %v597_v3  ;;  %v602_v54 = vshll.u32 %v2357_v9, %v596_v34 }
  0xee   : > { %v495_v48 = vadd.s32 %v493_v43, %v491_v40  ;;  %v603_v55 = vshrl.u32 %v2358_v11, %v597_v3  ;;  %v605_v57 = vshll.u32 %v2358_v11, %v596_v34  ;;  %v606_v59 = vshrl.u32 %v2359_v17, %v597_v3 }
  0xef   : > { %v608_v62 = vshll.u32 %v2359_v17, %v596_v34  ;;  %v518_v2 = vadd.s32 %v517_v52, %v507_v32  ;;  %v2630_v4 = vor.u32 %v600_v53, %v599_v51  ;;  %v609_v10 = vshrl.u32 %v2360_v24, %v597_v3 }
  0xf0   : > { %v496_v56 = vadd.s32 %v495_v48, %v485_v20  ;;  %v2632_v7 = vor.u32 %v603_v55, %v602_v54  ;;  %v2637_v18 = vor.u32 %v606_v59, %v605_v57  ;;  %v611_v19 = vshll.u32 %v2360_v24, %v596_v34 }
  0xf1   : > { %v612_v20 = vshrl.u32 %v2361_v27, %v597_v3  ;;  %v519_v21 = vadd.s32 %v518_v2, %v509_v38  ;;  %v610_v25 = vor.u32 %v609_v10, %v608_v62  ;;  %v2642_v26 = vadd.f32 %v2559_v37, %v421_v0 }
  0xf2   : > { %v2635_v15 = vadd.s32 %v496_v56, %v487_v28  ;;  %v520_v31 = vmul.u32 %v2586_v60, %v2611_v63  ;;  %vm614_vm12 = vcmp.lt.s32.totalorder %v2618_v47, 1  ;;  %vm617_vm13 = vcmp.lt.s32.totalorder %v2618_v47, 4 }
  0xf3   : > { %v613_v32 = vor.u32 %v612_v20, %v611_v19  ;;  %v523_v28 = vadd.s32 1, %v519_v21  ;;  %v622_v1 = vsel %vm614_vm12, %v2630_v4, %v2632_v7  ;;  %v631_v33 = vand.u32 65535, %v2613_v5 }
  0xf4   : > { %vm522_vm11 = vc.u32 %v2635_v15, %v2621_v50  ;;  %vm616_vm14 = vcmp.lt.s32.totalorder %v2618_v47, 3  ;;  %v623_v60 = vsel %vm617_vm13, %v610_v25, 920167782  ;;  %v626_v63 = vsel %vm614_vm12, %v2632_v7, %v2637_v18 }
  0xf5   : > { %v627_v34 = vsel %vm617_vm13, %v613_v32, 1326507024  ;;  %v524_v36 = vsel %vm522_vm11, %v523_v28, %v519_v21  ;;  %vm615_vm15 = vcmp.lt.s32.totalorder %v2618_v47, 2  ;;  %v624_v38 = vsel %vm616_vm14, %v2637_v18, %v623_v60 }
  0xf6   : > { %v628_v39 = vsel %vm616_vm14, %v610_v25, %v627_v34  ;;  %v525_v40 = vadd.s32 %v524_v36, %v520_v31  ;;  %v625_v41 = vsel %vm615_vm15, %v622_v1, %v624_v38  ;;  %v632_v46 = vshrl.u32 %v2613_v5, 16 }
  0xf7   : > { %v629_v43 = vsel %vm615_vm15, %v626_v63, %v628_v39  ;;  %v655_v51 = vand.u32 65535, %v625_v41  ;;  %v656_v52 = vshrl.u32 %v625_v41, 16  ;;  %v737_v59 = vand.u32 2147483647, %v2642_v26 }
  0xf8   : > { %v633_v48 = vand.u32 65535, %v629_v43  ;;  %v634_v49 = vshrl.u32 %v629_v43, 16  ;;  %v526_v53 = vadd.s32 536870912, %v525_v40  ;;  %v598_v62 = vshrl.u32 %v2356_v6, %v597_v3 }
  0xf9   : > { %v658_v57 = vmul.u32 %v656_v52, %v631_v33  ;;  %v659_v10 = vmul.u32 %v655_v51, %v632_v46  ;;  %v740_v25 = vand.u32 2139095040, %v2642_v26  ;;  %v657_v28 = vmul.u32 %v655_v51, %v631_v33 }
  0xfa   : > { %v636_v54 = vmul.u32 %v634_v49, %v631_v33  ;;  %v637_v55 = vmul.u32 %v633_v48, %v632_v46  ;;  %v2675_v56 = vshrl.u32 %v526_v53, 30  ;;  %v635_v0 = vmul.u32 %v633_v48, %v631_v33 }
  0xfb   : > { %v638_v20 = vmul.u32 %v634_v49, %v632_v46  ;;  %v661_v21 = vshll.u32 %v658_v57, 16  ;;  %v660_v34 = vmul.u32 %v656_v52, %v632_v46  ;;  %v663_v3 = vshll.u32 %v659_v10, 16 }
  0xfc   : > { %v639_v2 = vshll.u32 %v636_v54, 16  ;;  %v528_v19 = vshll.u32 %v2675_v56, 30  ;;  %v641_v31 = vshll.u32 %v637_v55, 16  ;;  %v640_v60 = vshrl.u32 %v636_v54, 16 }
  0xfd   : > { %vm665_vm3 = vc.u32 %v657_v28, %v661_v21  ;;  %v667_v48 = vadd.s32 %v661_v21, %v657_v28  ;;  %v741_v53 = vshrl.u32 %v740_v25, 23  ;;  %v1751_v46 = vmul.f32 %v2548_v29, %v2513_v12 }
  0xfe   : > { %vm643_vm1 = vc.u32 %v635_v0, %v639_v2  ;;  %v645_v32 = vadd.s32 %v639_v2, %v635_v0  ;;  %v529_v1 = vsub.s32 %v525_v40, %v528_v19  ;;  %v666_v41 = vsel %vm665_vm3, 1, %v2362_v35 }
  0xff   : > { %v644_v63 = vsel %vm643_vm1, 1, %v2362_v35  ;;  %v668_v49 = vadd.s32 %v666_v41, %v660_v34  ;;  %v618_v40 = vsel %vm614_vm12, %v598_v62, %v2630_v4  ;;  %v1747_v51 = vmul.f32 %v2537_v22, %v2513_v12 }
 0x100   : > { %v646_v36 = vadd.s32 %v644_v63, %v638_v20  ;;  %vm647_vm2 = vc.u32 %v645_v32, %v641_v31  ;;  %vm530_vm4 = vcmp.lt.s32.totalorder %v529_v1, 0  ;;  %v531_v38 = vsub.s32 0, %v529_v1 }
 0x101   : > { %v648_v39 = vsel %vm647_vm2, 1, %v2362_v35  ;;  %v619_v54 = vsel %vm617_vm13, %v2637_v18, 2102212464  ;;  %vm669_vm5 = vc.u32 %v667_v48, %v663_v3  ;;  %v642_v2 = vshrl.u32 %v637_v55, 16 }
 0x102   : > { %v650_v43 = vadd.s32 %v648_v39, %v646_v36  ;;  %v532_v33 = vsel %vm530_vm4, %v531_v38, %v529_v1  ;;  %v670_v19 = vsel %vm669_vm5, 1, %v2362_v35  ;;  %v2030_v20 = vadd.s32 4294967169, %v741_v53 }
 0x103   : > { %v533_v52 = vclz %v532_v33  ;;  %v1789_v21 = vsel %vm280_vm0, %v1751_v46, 0.0  ;;  %v662_v62 = vshrl.u32 %v658_v57, 16  ;;  %v672_v25 = vadd.s32 %v670_v19, %v668_v49 }
 0x104   : > { %v651_v0 = vadd.s32 %v650_v43, %v640_v60  ;;  %1790 = vadd.xlane.f32.xlu2 %v1789_v21  ;;  %v1777_v29 = vsel %vm280_vm0, %v1747_v51, 0.0  ;;  %v620_v22 = vsel %vm616_vm14, %v2632_v7, %v619_v54  ;;  %v747_v18 = vadd.s32 1, %v2030_v20 }
 0x105   : > { %v2025_v4 = vadd.s32 4294967294, %v533_v52  ;;  %1778 = vadd.xlane.f32.xlu1 %v1777_v29  ;;  %v1755_v55 = vmul.f32 %v2569_v44, %v2513_v12  ;;  %v664_v32 = vshrl.u32 %v659_v10, 16  ;;  %v673_v28 = vadd.s32 %v672_v25, %v662_v62 }
 0x106   : > { %v2700_v31 = vadd.s32 %v651_v0, %v642_v2  ;;  %v521_v57 = vadd.s32 %v2621_v50, %v2635_v15  ;;  %v2706_v63 = vadd.s32 %v667_v48, %v663_v3  ;;  %vm748_vm7 = vcmp.gt.s32.totalorder %v747_v18, 0 }
 0x107   : > { %vm2026_vm6 = vcmp.lt.s32.totalorder %v2025_v4, 0  ;;  %v621_v7 = vsel %vm615_vm15, %v618_v40, %v620_v22  ;;  %v674_v38 = vadd.s32 %v673_v28, %v664_v32  ;;  %v744_v12 = vand.u32 8388607, %v737_v59 }
 0x108   : > { %v536_v60 = vsel %vm2026_vm6, 0, %v2025_v4  ;;  %vm677_vm8 = vc.u32 %v2700_v31, %v2706_v63  ;;  %v749_v44 = vsel %vm748_vm7, %v747_v18, 0  ;;  %v1801_v10 = vsel %vm280_vm0, %v1755_v55, 0.0  ;;  %v424_v55 = vpop.f32.mrf.mxu1 }
 0x109   : > { %v537_v34 = vsub.s32 32, %v536_v60  ;;  %v541_v36 = vsub.s32 4294967266, %v536_v60  ;;  %v538_v50 = vshll.u32 %v529_v1, %v536_v60  ;;  %v678_v39 = vadd.s32 1, %v674_v38  ;;  %1802 = vadd.xlane.f32.xlu0 %v1801_v10 }
 0x10a   : > { %v675_v41 = vmul.u32 %v2613_v5, %v621_v7  ;;  %v751_v43 = vand.u32 31, %v749_v44  ;;  %v745_v33 = vor.u32 8388608, %v744_v12  ;;  %v2716_v40 = vshrl.u32 %v749_v44, 5 }
 0x10b   : > { %v539_v15 = vshrl.u32 %v521_v57, %v537_v34  ;;  %v542_v3 = vadd.s32 127, %v541_v36  ;;  %v679_v49 = vsel %vm677_vm8, %v678_v39, %v674_v38  ;;  %v2738_v38 = vadd.f32 %v2559_v37, %v424_v55 }
 0x10c   : > { %v680_v53 = vadd.s32 %v679_v49, %v675_v41  ;;  %v752_v46 = vsub.s32 32, %v751_v43  ;;  %v754_v54 = vshll.u32 %v2356_v6, %v751_v43  ;;  %v757_v1 = vshll.u32 %v2357_v9, %v751_v43 }
 0x10d   : > { %v540_v47 = vor.u32 %v539_v15, %v538_v50  ;;  %v543_v48 = vshll.u32 %v542_v3, 23  ;;  %v760_v19 = vshll.u32 %v2358_v11, %v751_v43  ;;  %v763_v4 = vshll.u32 %v2359_v17, %v751_v43 }
 0x10e   : > { %v681_v0 = vadd.s32 536870912, %v680_v53  ;;  %v755_v2 = vshrl.u32 %v2357_v9, %v752_v46  ;;  %v758_v5 = vshrl.u32 %v2358_v11, %v752_v46  ;;  %v761_v21 = vshrl.u32 %v2359_v17, %v752_v46 }
 0x10f   : > { %v544_v51 = vor.u32 4788187, %v543_v48  ;;  %v547_v52 = vcvt.s32.f32 %v540_v47  ;;  %v764_v62 = vshrl.u32 %v2360_v24, %v752_v46  ;;  %v767_v18 = vshrl.u32 %v2361_v27, %v752_v46 }
 0x110   : > { %v2726_v25 = vshrl.u32 %v681_v0, 30  ;;  %v756_v29 = vor.u32 %v755_v2, %v754_v54  ;;  %v2728_v22 = vor.u32 %v758_v5, %v757_v1  ;;  %v762_v32 = vor.u32 %v761_v21, %v760_v19 }
 0x111   : > { %v545_v20 = vand.u32 2147483647, %v544_v51  ;;  %v765_v28 = vor.u32 %v764_v62, %v763_v4  ;;  %v766_v57 = vshll.u32 %v2360_v24, %v751_v43  ;;  %v2732_v60 = vshll.u32 %v745_v33, 8 }
 0x112   : > { %v683_v36 = vshll.u32 %v2726_v25, 30  ;;  %vm769_vm9 = vcmp.lt.s32.totalorder %v2716_v40, 1  ;;  %vm772_vm10 = vcmp.lt.s32.totalorder %v2716_v40, 4  ;;  %vm771_vm11 = vcmp.lt.s32.totalorder %v2716_v40, 3 }
 0x113   : > { %v548_v34 = vmul.f32 %v547_v52, %v545_v20  ;;  %v768_v7 = vor.u32 %v767_v18, %v766_v57  ;;  %v777_v44 = vsel %vm769_vm9, %v756_v29, %v2728_v22  ;;  %v778_v10 = vsel %vm772_vm10, %v765_v28, 920167782 }
 0x114   : > { %v684_v12 = vsub.s32 %v680_v53, %v683_v36  ;;  %vm429_vm12 = vcmp.lt.s32.totalorder %v2566_v42, 0  ;;  %v779_v50 = vsel %vm771_vm11, %v762_v32, %v778_v10  ;;  %v786_v15 = vand.u32 65535, %v2732_v60 }
 0x115   : > { %v549_v3 = vxor.u32 2147483648, %v548_v34  ;;  %vm770_vm14 = vcmp.lt.s32.totalorder %v2716_v40, 2  ;;  %v781_v41 = vsel %vm769_vm9, %v2728_v22, %v762_v32  ;;  %v782_v43 = vsel %vm772_vm10, %v768_v7, 1326507024 }
 0x116   : > { %vm685_vm13 = vcmp.lt.s32.totalorder %v684_v12, 0  ;;  %v686_v37 = vsub.s32 0, %v684_v12  ;;  %v780_v39 = vsel %vm770_vm14, %v777_v44, %v779_v50  ;;  %v787_v47 = vshrl.u32 %v2732_v60, 16 }
 0x117   : > { %v783_v49 = vsel %vm771_vm11, %v765_v28, %v782_v43  ;;  %v811_v53 = vshrl.u32 %v780_v39, 16  ;;  %v892_v33 = vand.u32 2147483647, %v2738_v38  ;;  %v753_v52 = vshrl.u32 %v2356_v6, %v752_v46 }
 0x118   : > { %v687_v48 = vsel %vm685_vm13, %v686_v37, %v684_v12  ;;  %v784_v54 = vsel %vm770_vm14, %v781_v41, %v783_v49  ;;  %v810_v1 = vand.u32 65535, %v780_v39  ;;  %v550_v0 = vsel %vm429_vm12, %v549_v3, %v548_v34 }
 0x119   : > { %v688_v51 = vclz %v687_v48  ;;  %v788_v2 = vand.u32 65535, %v784_v54  ;;  %v789_v5 = vshrl.u32 %v784_v54, 16  ;;  %v2767_v19 = vmul.u32 %v811_v53, %v786_v15 }
 0x11a   : > { %vm2771_vm15 = vcmp.le.f32.partialorder %v427_v45, 0.7853982  ;;  %v676_v46 = vadd.s32 %v2706_v63, %v2700_v31  ;;  %v895_v4 = vand.u32 2139095040, %v2738_v38  ;;  %v2780_v62 = vsel %vm769_vm9, %v753_v52, %v756_v29 }
 0x11b   : > { %v2028_v21 = vadd.s32 4294967294, %v688_v51  ;;  %v791_v18 = vmul.u32 %v789_v5, %v786_v15  ;;  %v792_v55 = vmul.u32 %v788_v2, %v787_v47  ;;  %v2784_v28 = vand.u32 8388607, %v892_v33 }
 0x11c   : > { %v2789_v45 = vsel %vm2771_vm15, %v2566_v42, %v550_v0  ;;  %v774_v31 = vsel %vm772_vm10, %v762_v32, 2102212464  ;;  %v812_v63 = vmul.u32 %v810_v1, %v786_v15  ;;  %v790_v34 = vmul.u32 %v788_v2, %v786_v15 }
 0x11d   : > { %vm2029_vm1 = vcmp.lt.s32.totalorder %v2028_v21, 0  ;;  %v794_v29 = vshll.u32 %v791_v18, 16  ;;  %v816_v36 = vshll.u32 %v2767_v19, 16  ;;  %v814_v10 = vmul.u32 %v810_v1, %v787_v47 }
 0x11e   : > { %v691_v57 = vsel %vm2029_vm1, 0, %v2028_v21  ;;  %v815_v50 = vmul.u32 %v811_v53, %v787_v47  ;;  %v793_v3 = vmul.u32 %v789_v5, %v787_v47  ;;  %v796_v37 = vshll.u32 %v792_v55, 16  ;;  %v1992_v5 = vld [vmem:[#allocation5] sm:$0xf] }
 0x11f   : > { %v692_v7 = vsub.s32 32, %v691_v57  ;;  %v696_v44 = vsub.s32 4294967266, %v691_v57  ;;  %vm798_vm2 = vc.u32 %v790_v34, %v794_v29  ;;  %v800_v39 = vadd.s32 %v794_v29, %v790_v34  ;;  %v2000_v34 = vld [vmem:[#allocation5 + $0x8] sm:$0xf]  ;;  %v2069_v29 = vld [vmem:[#allocation5 + $0x20] sm:$0xf0] }
 0x120   : > { %v693_v41 = vshll.u32 %v684_v12, %v691_v57  ;;  %v799_v49 = vsel %vm798_vm2, 1, %v2362_v35  ;;  %v795_v32 = vshrl.u32 %v791_v18, 16  ;;  %vm820_vm4 = vc.u32 %v812_v63, %v816_v36  ;;  %v2068_v12 = vld [vmem:[#allocation5 + $0x18] sm:$0xf0] }
 0x121   : > { %v694_v43 = vshrl.u32 %v676_v46, %v692_v7  ;;  %v697_v48 = vadd.s32 127, %v696_v44  ;;  %v801_v51 = vadd.s32 %v799_v49, %v793_v3  ;;  %vm802_vm3 = vc.u32 %v800_v39, %v796_v37  ;;  %v2008_v39 = vld [vmem:[#allocation5 + $0x10] sm:$0xf] }
 0x122   : > { %v803_v54 = vsel %vm802_vm3, 1, %v2362_v35  ;;  %v818_v0 = vshll.u32 %v814_v10, 16  ;;  %v821_v47 = vsel %vm820_vm4, 1, %v2362_v35  ;;  %v822_v53 = vadd.s32 %v816_v36, %v812_v63 }
 0x123   : > { %v695_v15 = vor.u32 %v694_v43, %v693_v41  ;;  %v698_v52 = vshll.u32 %v697_v48, 23  ;;  %v805_v1 = vadd.s32 %v803_v54, %v801_v51  ;;  %v896_v2 = vshrl.u32 %v895_v4, 23  ;;  %v2070_v51 = vld [vmem:[#allocation5 + $0x28] sm:$0xf0] }
 0x124   : > { %v2799_v46 = vmul.f32 %v2789_v45, %v2789_v45  ;;  %v775_v18 = vsel %vm771_vm11, %v2728_v22, %v774_v31  ;;  %v823_v57 = vadd.s32 %v821_v47, %v815_v50  ;;  %v797_v7 = vshrl.u32 %v792_v55, 16 }
 0x125   : > { %v699_v21 = vor.u32 4788187, %v698_v52  ;;  %v806_v44 = vadd.s32 %v805_v1, %v795_v32  ;;  %vm824_vm5 = vc.u32 %v822_v53, %v818_v0  ;;  %v2033_v3 = vadd.s32 4294967169, %v896_v2 }
 0x126   : > { %v702_v4 = vcvt.s32.f32 %v695_v15  ;;  %v825_v36 = vsel %vm824_vm5, 1, %v2362_v35  ;;  %v1993_v37 = vor.u32 %v2068_v12, %v1992_v5  ;;  %v817_v41 = vshrl.u32 %v2767_v19, 16 }
 0x127   : > { %v700_v63 = vand.u32 2147483647, %v699_v21  ;;  %v827_v43 = vadd.s32 %v825_v36, %v823_v57  ;;  %v902_v48 = vadd.s32 1, %v2033_v3  ;;  %v2001_v49 = vor.u32 %v2069_v29, %v2000_v34 }
 0x128   : > { %v563_v22 = vmul.f32 -0.00019511016, %v2799_v46  ;;  %v2807_v50 = vadd.s32 %v806_v44, %v797_v7  ;;  %294 = vmatpush.bf16.msra.mxu0 %v1993_v37  ;;  %v2009_v55 = vor.u32 %v2070_v51, %v2008_v39  ;;  %v776_v32 = vsel %vm770_vm14, %v2780_v62, %v775_v18 }
 0x129   : > { %v703_v31 = vmul.f32 %v702_v4, %v700_v63  ;;  %v819_v15 = vshrl.u32 %v814_v10, 16  ;;  %v828_v52 = vadd.s32 %v827_v43, %v817_v41  ;;  %vm903_vm6 = vcmp.gt.s32.totalorder %v902_v48, 0  ;;  %332 = vmatpush.bf16.msra.mxu2 %v2001_v49 }
 0x12a   : > { %v2812_v54 = vadd.s32 %v822_v53, %v818_v0  ;;  %v904_v1 = vsel %vm903_vm6, %v902_v48, 0  ;;  %vm2816_vm7 = vcmp.le.f32.partialorder %v582_v61, 0.7853982  ;;  %vm584_vm8 = vcmp.lt.s32.totalorder %v2583_v58, 0 }
 0x12b   : > { %v704_v19 = vxor.u32 2147483648, %v703_v31  ;;  %v829_v2 = vadd.s32 %v828_v52, %v819_v15  ;;  %v906_v40 = vand.u32 31, %v904_v1  ;;  %2010 = vmatmul.msk.bf16.vlgmr.msra.gmra.mxu0 %vm280_vm0, %v2507_v8  ;;  %v564_v62 = vadd.f32 0.008332121, %v563_v22 }
 0x12c   : > { %370 = vmatpush.bf16.msrb.mxu0 %v2009_v55  ;;  %v830_v0 = vmul.u32 %v2732_v60, %v776_v32  ;;  %vm832_vm9 = vc.u32 %v2807_v50, %v2812_v54  ;;  %2014 = vmatmul.msk.bf16.vlgmr.msra.gmra.mxu2 %vm280_vm0, %v2507_v8  ;;  %v900_v5 = vor.u32 8388608, %v2784_v28  ;;  %v2840_v60 = vshrl.u32 %v904_v1, 5 }
 0x12d   : > { %v705_v10 = vsel %vm584_vm8, %v704_v19, %v703_v31  ;;  %v833_v53 = vadd.s32 1, %v829_v2  ;;  %v907_v12 = vsub.s32 32, %v906_v40  ;;  %v909_v18 = vshll.u32 %v2356_v6, %v906_v40 }
 0x12e   : > { %v2833_v61 = vsel %vm2816_vm7, %v2583_v58, %v705_v10  ;;  %v912_v57 = vshll.u32 %v2357_v9, %v906_v40  ;;  %v915_v44 = vshll.u32 %v2358_v11, %v906_v40  ;;  %v918_v63 = vshll.u32 %v2359_v17, %v906_v40 }
 0x12f   : > { %v2838_v21 = vmul.f32 %v2833_v61, %v2833_v61  ;;  %v834_v34 = vsel %vm832_vm9, %v833_v53, %v829_v2  ;;  %v910_v29 = vshrl.u32 %v2357_v9, %v907_v12  ;;  %v913_v7 = vshrl.u32 %v2358_v11, %v907_v12 }
 0x130   : > { %v835_v3 = vadd.s32 %v834_v34, %v830_v0  ;;  %v916_v28 = vshrl.u32 %v2359_v17, %v907_v12  ;;  %v919_v4 = vshrl.u32 %v2360_v24, %v907_v12  ;;  %v921_v39 = vshll.u32 %v2360_v24, %v906_v40 }
 0x131   : > { %v911_v36 = vor.u32 %v910_v29, %v909_v18  ;;  %v2850_v37 = vor.u32 %v913_v7, %v912_v57  ;;  %v922_v41 = vshrl.u32 %v2361_v27, %v907_v12  ;;  %v565_v49 = vmul.f32 %v564_v62, %v2799_v46 }
 0x132   : > { %v836_v43 = vadd.s32 536870912, %v835_v3  ;;  %v917_v9 = vor.u32 %v916_v28, %v915_v44  ;;  %v920_v48 = vor.u32 %v919_v4, %v918_v63  ;;  %v718_v51 = vmul.f32 -0.00019511016, %v2838_v21 }
 0x133   : > { %v923_v11 = vor.u32 %v922_v41, %v921_v39  ;;  %vm924_vm10 = vcmp.lt.s32.totalorder %v2840_v60, 1  ;;  %vm927_vm11 = vcmp.lt.s32.totalorder %v2840_v60, 4  ;;  %vm926_vm13 = vcmp.lt.s32.totalorder %v2840_v60, 3 }
 0x134   : > { %v2856_v22 = vshrl.u32 %v836_v43, 30  ;;  %v932_v17 = vsel %vm924_vm10, %v911_v36, %v2850_v37  ;;  %v933_v24 = vsel %vm927_vm11, %v920_v48, 920167782  ;;  %v2866_v27 = vshll.u32 %v900_v5, 8 }
 0x135   : > { %vm925_vm14 = vcmp.lt.s32.totalorder %v2840_v60, 2  ;;  %v934_v55 = vsel %vm926_vm13, %v917_v9, %v933_v24  ;;  %v936_v32 = vsel %vm924_vm10, %v2850_v37, %v917_v9  ;;  %v937_v52 = vsel %vm927_vm11, %v923_v11, 1326507024 }
 0x136   : > { %v838_v31 = vshll.u32 %v2856_v22, 30  ;;  %v935_v15 = vsel %vm925_vm14, %v932_v17, %v934_v55  ;;  %v719_v19 = vadd.f32 0.008332121, %v718_v51  ;;  %v938_v2 = vsel %vm926_vm13, %v920_v48, %v937_v52 }
 0x137   : > { %v965_v40 = vand.u32 65535, %v935_v15  ;;  %v2881_v62 = vadd.f32 -0.16666654, %v565_v49  ;;  %v939_v10 = vsel %vm925_vm14, %v936_v32, %v938_v2  ;;  %v941_v0 = vand.u32 65535, %v2866_v27 }
 0x138   : > { %v839_v1 = vsub.s32 %v835_v3, %v838_v31  ;;  %v966_v53 = vshrl.u32 %v935_v15, 16  ;;  %v942_v18 = vshrl.u32 %v2866_v27, 16  ;;  %v943_v57 = vand.u32 65535, %v939_v10 }
 0x139   : > { %v831_v34 = vadd.s32 %v2812_v54, %v2807_v50  ;;  %v908_v29 = vshrl.u32 %v2356_v6, %v907_v12  ;;  %v944_v7 = vshrl.u32 %v939_v10, 16  ;;  %v720_v3 = vmul.f32 %v719_v19, %v2838_v21 }
 0x13a   : > { %vm840_vm1 = vcmp.lt.s32.totalorder %v839_v1, 0  ;;  %v841_v5 = vsub.s32 0, %v839_v1  ;;  %v968_v44 = vmul.u32 %v966_v53, %v941_v0  ;;  %v947_v63 = vmul.u32 %v943_v57, %v942_v18 }
 0x13b   : > { %2011 = vmatmul.msk.bf16.gmra.mxu0 %vm280_vm0, %v2516_v13  ;;  %v969_v4 = vmul.u32 %v965_v40, %v942_v18  ;;  %v928_v41 = vsel %vm924_vm10, %v908_v29, %v911_v36  ;;  %v929_v6 = vsel %vm927_vm11, %v917_v9, 2102212464  ;;  %v946_v50 = vmul.u32 %v944_v7, %v941_v0 }
 0x13c   : > { %v842_v28 = vsel %vm840_vm1, %v841_v5, %v839_v1  ;;  %2015 = vmatmul.msk.bf16.gmra.mxu2 %vm280_vm0, %v2516_v13  ;;  %v945_v54 = vmul.u32 %v943_v57, %v941_v0  ;;  %v948_v12 = vmul.u32 %v944_v7, %v942_v18  ;;  %v967_v43 = vmul.u32 %v965_v40, %v941_v0 }
 0x13d   : > { %v843_v39 = vclz %v842_v28  ;;  %v971_v48 = vshll.u32 %v968_v44, 16  ;;  %v949_v11 = vshll.u32 %v946_v50, 16  ;;  %v951_v51 = vshll.u32 %v947_v63, 16 }
 0x13e   : > { %v970_v17 = vmul.u32 %v966_v53, %v942_v18  ;;  %v973_v24 = vshll.u32 %v969_v4, 16  ;;  %v556_v55 = vmul.f32 -0.001358992, %v2799_v46  ;;  %v972_v10 = vshrl.u32 %v968_v44, 16 }
 0x13f   : > { %v2031_v49 = vadd.s32 4294967294, %v843_v39  ;;  %vm975_vm2 = vc.u32 %v967_v43, %v971_v48  ;;  %v977_v31 = vadd.s32 %v971_v48, %v967_v43  ;;  %vm953_vm4 = vc.u32 %v945_v54, %v949_v11 }
 0x140   : > { %v955_v36 = vadd.s32 %v949_v11, %v945_v54  ;;  %v976_v32 = vsel %vm975_vm2, 1, %v2362_v35  ;;  %v954_v15 = vsel %vm953_vm4, 1, %v2362_v35  ;;  %v557_v5 = vadd.f32 0.041655596, %v556_v55 }
 0x141   : > { %vm2032_vm3 = vcmp.lt.s32.totalorder %v2031_v49, 0  ;;  %v978_v52 = vadd.s32 %v976_v32, %v970_v17  ;;  %vm979_vm5 = vc.u32 %v977_v31, %v973_v24  ;;  %v956_v40 = vadd.s32 %v954_v15, %v948_v12 }
 0x142   : > { %v846_v9 = vsel %vm2032_vm3, 0, %v2031_v49  ;;  %vm957_vm6 = vc.u32 %v955_v36, %v951_v51  ;;  %v980_v53 = vsel %vm979_vm5, 1, %v2362_v35  ;;  %v930_v28 = vsel %vm926_vm13, %v2850_v37, %v929_v6 }
 0x143   : > { %v847_v19 = vsub.s32 32, %v846_v9  ;;  %v851_v2 = vsub.s32 4294967266, %v846_v9  ;;  %v848_v0 = vshll.u32 %v839_v1, %v846_v9  ;;  %v958_v29 = vsel %vm957_vm6, 1, %v2362_v35 }
 0x144   : > { %v982_v7 = vadd.s32 %v980_v53, %v978_v52  ;;  %v950_v39 = vshrl.u32 %v946_v50, 16  ;;  %v960_v54 = vadd.s32 %v958_v29, %v956_v40  ;;  %v974_v43 = vshrl.u32 %v969_v4, 16 }
 0x145   : > { %v849_v18 = vshrl.u32 %v831_v34, %v847_v19  ;;  %v852_v57 = vadd.s32 127, %v851_v2  ;;  %v558_v1 = vmul.f32 %v557_v5, %v2799_v46  ;;  %v551_v49 = vsub.s32 4, %v2675_v56  ;;  %v2071_v5 = vld [vmem:[#allocation5 + $0x2c] sm:$0xf0] }
 0x146   : > { %v983_v44 = vadd.s32 %v982_v7, %v972_v10  ;;  %v952_v11 = vshrl.u32 %v947_v63, 16  ;;  %v961_v34 = vadd.s32 %v960_v54, %v950_v39  ;;  %v567_v35 = vmul.f32 %v2881_v62, %v2799_v46  ;;  %v2072_v10 = vld [vmem:[#allocation5 + $0x30] sm:$0xf0] }
 0x147   : > { %v850_v48 = vor.u32 %v849_v18, %v848_v0  ;;  %v853_v12 = vshll.u32 %v852_v57, 23  ;;  %v931_v17 = vsel %vm925_vm14, %v928_v41, %v930_v28  ;;  %v721_v6 = vadd.f32 -0.16666654, %v720_v3  ;;  %v2056_v0 = vld [vmem:[#allocation5 + $0x14] sm:$0xf] }
 0x148   : > { %v984_v37 = vadd.s32 %v983_v44, %v974_v43  ;;  %v2913_v50 = vadd.s32 %v961_v34, %v952_v11  ;;  %v981_v4 = vadd.s32 %v977_v31, %v973_v24  ;;  %v559_v63 = vadd.f32 -0.4999988, %v558_v1 }
 0x149   : > { %v854_v51 = vor.u32 4788187, %v853_v12  ;;  %v857_v36 = vcvt.s32.f32 %v850_v48  ;;  %v706_v9 = vsub.s32 4, %v2726_v25  ;;  %v985_v62 = vmul.u32 %v2866_v27, %v931_v17 }
 0x14a   : > { %v988_v32 = vadd.s32 1, %v984_v37  ;;  %vm987_vm9 = vc.u32 %v2913_v50, %v981_v4  ;;  %v552_v60 = vsel %vm429_vm12, %v551_v49, %v2675_v56  ;;  %v568_v3 = vadd.f32 1.0, %v567_v35  ;;  %v2050_v56 = vld [vmem:[#allocation5 + $0x18] sm:$0xf] }
 0x14b   : > { %v855_v55 = vand.u32 2147483647, %v854_v51  ;;  %2018 = vmatmul.msk.bf16.vlgmr.msrb.gmra.mxu0 %vm280_vm0, %v2507_v8  ;;  %v722_v15 = vmul.f32 %v721_v6, %v2838_v21  ;;  %v560_v52 = vmul.f32 %v559_v63, %v2799_v46  ;;  %v554_v8 = vsel %vm2771_vm15, 0, %v552_v60 }
 0x14c   : > { %v989_v24 = vsel %vm987_vm9, %v988_v32, %v984_v37  ;;  %v707_v27 = vsel %vm584_vm8, %v706_v9, %v2726_v25  ;;  %v2931_v40 = vmul.f32 %v568_v3, %v2789_v45  ;;  %vm739_vm12 = vcmp.lt.s32.totalorder %v2642_v26, 0 }
 0x14d   : > { %v858_v41 = vmul.f32 %v857_v36, %v855_v55  ;;  %v990_v31 = vadd.s32 %v989_v24, %v985_v62  ;;  %v2051_v46 = vor.u32 %v2072_v10, %v2050_v56  ;;  %v709_v20 = vsel %vm2816_vm7, 0, %v707_v27 }
 0x14e   : > { %v723_v18 = vadd.f32 1.0, %v722_v15  ;;  %v2057_v57 = vor.u32 %v2071_v5, %v2056_v0  ;;  %v561_v25 = vadd.f32 1.0, %v560_v52  ;;  %v711_v7 = vmul.f32 -0.001358992, %v2838_v21 }
 0x14f   : > { %v859_v19 = vxor.u32 2147483648, %v858_v41  ;;  %v991_v2 = vadd.s32 536870912, %v990_v31  ;;  %1690 = vmatpush.bf16.msrb.mxu2 %v2051_v46  ;;  %v1195_v28 = vand.u32 3, %v554_v8  ;;  %vm2944_vm15 = vcmp.le.f32.partialorder %v737_v59, 0.7853982 }
 0x150   : > { %1721 = vmatpush.bf16.msrb.mxu3 %v2057_v57  ;;  %v575_v47 = vxor.u32 2147483648, %v2931_v40  ;;  %v571_v54 = vadd.s32 3, %v554_v8  ;;  %v712_v48 = vadd.f32 0.041655596, %v711_v7  ;;  %v1349_v12 = vand.u32 3, %v709_v20 }
 0x151   : > { %v2934_v53 = vshrl.u32 %v991_v2, 30  ;;  %v860_v29 = vsel %vm739_vm12, %v859_v19, %v858_v41  ;;  %v726_v44 = vadd.s32 3, %v709_v20  ;;  %v724_v1 = vmul.f32 %v723_v18, %v2833_v61 }
 0x152   : > { %v2955_v49 = vsel %vm2944_vm15, %v2642_v26, %v860_v29  ;;  %vm570_vm7 = vweird.f32 %v2566_v42  ;;  %v578_v59 = vxor.u32 2147483648, %v561_v25  ;;  %v713_v34 = vmul.f32 %v712_v48, %v2838_v21 }
 0x153   : > { %v993_v45 = vshll.u32 %v2934_v53, 30  ;;  %vm1197_vm10 = vcmp.eq.s32.totalorder %v1195_v28, 0  ;;  %vm1196_vm11 = vcmp.lt.s32.totalorder %v1195_v28, 2  ;;  %vm1200_vm13 = vcmp.eq.s32.totalorder %v1195_v28, 2 }
 0x154   : > { %v1199_v35 = vsel %vm1197_vm10, %v561_v25, %v575_v47  ;;  %v572_v51 = vand.u32 3, %v571_v54  ;;  %v2963_v61 = vmul.f32 %v2955_v49, %v2955_v49  ;;  %v714_v37 = vadd.f32 -0.4999988, %v713_v34 }
 0x155   : > { %v2949_v43 = vsub.s32 %v990_v31, %v993_v45  ;;  %vm1350_vm14 = vcmp.lt.s32.totalorder %v1349_v12, 2  ;;  %v727_v6 = vand.u32 3, %v726_v44  ;;  %v986_v55 = vadd.s32 %v981_v4, %v2913_v50 }
 0x156   : > { %vm725_vm1 = vweird.f32 %v2583_v58  ;;  %v1202_v32 = vsel %vm1200_vm13, %v578_v59, %v2931_v40  ;;  %vm1351_vm2 = vcmp.eq.s32.totalorder %v1349_v12, 0  ;;  %v715_v63 = vmul.f32 %v714_v37, %v2838_v21 }
 0x157   : > { %vm995_vm8 = vcmp.lt.s32.totalorder %v2949_v43, 0  ;;  %v996_v11 = vsub.s32 0, %v2949_v43  ;;  %v730_v9 = vxor.u32 2147483648, %v724_v1  ;;  %v1203_v62 = vsel %vm1196_vm11, %v1199_v35, %v1202_v32 }
 0x158   : > { %vm1354_vm3 = vcmp.eq.s32.totalorder %v1349_v12, 2  ;;  %vm573_vm4 = vcmp.lt.s32.totalorder %v572_v51, 2  ;;  %vm574_vm5 = vcmp.eq.s32.totalorder %v572_v51, 0  ;;  %vm577_vm6 = vcmp.eq.s32.totalorder %v572_v51, 2 }
 0x159   : > { %v997_v17 = vsel %vm995_vm8, %v996_v11, %v2949_v43  ;;  %v716_v50 = vadd.f32 1.0, %v715_v63  ;;  %v576_v4 = vsel %vm574_vm5, %v561_v25, %v575_v47  ;;  %vm728_vm9 = vcmp.lt.s32.totalorder %v727_v6, 2 }
 0x15a   : > { %v998_v36 = vclz %v997_v17  ;;  %v1204_v3 = vsel %vm570_vm7, nan, %v1203_v62  ;;  %v579_v41 = vsel %vm577_vm6, %v578_v59, %v2931_v40  ;;  %vm729_vm10 = vcmp.eq.s32.totalorder %v727_v6, 0 }
 0x15b   : > { %2019 = vmatmul.msk.bf16.gmra.mxu0 %vm280_vm0, %v2516_v13  ;;  %v873_v13 = vmul.f32 -0.00019511016, %v2963_v61  ;;  %v733_v24 = vxor.u32 2147483648, %v716_v50  ;;  %v1353_v31 = vsel %vm1351_vm2, %v716_v50, %v730_v9  ;;  %v731_v15 = vsel %vm729_vm10, %v716_v50, %v730_v9 }
 0x15c   : > { %v2034_v60 = vadd.s32 4294967294, %v998_v36  ;;  %v580_v27 = vsel %vm573_vm4, %v576_v4, %v579_v41  ;;  %vm732_vm11 = vcmp.eq.s32.totalorder %v727_v6, 2  ;;  %v866_v25 = vmul.f32 -0.001358992, %v2963_v61 }
 0x15d   : > { %v1356_v2 = vsel %vm1354_vm3, %v733_v24, %v724_v1  ;;  %v734_v56 = vsel %vm732_vm11, %v733_v24, %v724_v1  ;;  %v874_v10 = vadd.f32 0.008332121, %v873_v13  ;;  %v581_v18 = vsel %vm570_vm7, nan, %v580_v27 }
 0x15e   : > { %vm2035_vm8 = vcmp.lt.s32.totalorder %v2034_v60, 0  ;;  %v1357_v40 = vsel %vm1350_vm14, %v1353_v31, %v1356_v2  ;;  %v735_v5 = vsel %vm728_vm9, %v731_v15, %v734_v56  ;;  %v867_v42 = vadd.f32 0.041655596, %v866_v25 }
 0x15f   : > { %v1001_v21 = vsel %vm2035_vm8, 0, %v2034_v60  ;;  %v1358_v20 = vsel %vm725_vm1, nan, %v1357_v40  ;;  %v736_v57 = vsel %vm725_vm1, nan, %v735_v5  ;;  %v875_v54 = vmul.f32 %v874_v10, %v2963_v61 }
 0x160   : > { %v1002_v52 = vsub.s32 32, %v1001_v21  ;;  %v1006_v8 = vsub.s32 4294967266, %v1001_v21  ;;  %v1003_v19 = vshll.u32 %v2949_v43, %v1001_v21  ;;  %v1667_v7 = vpack.c.bf16 %v1358_v20, %v1204_v3 }
 0x161   : > { %v1047_v28 = vpack.c.bf16 %v736_v57, %v581_v18  ;;  %v861_v58 = vsub.s32 4, %v2856_v22  ;;  %v876_v44 = vadd.f32 -0.16666654, %v875_v54  ;;  %v868_v59 = vmul.f32 %v867_v42, %v2963_v61 }
 0x162   : > { %v1004_v0 = vshrl.u32 %v986_v55, %v1002_v52  ;;  %v1007_v46 = vadd.s32 127, %v1006_v8  ;;  %2052 = vmatmul.msk.bf16.vlgmr.msrb.gmra.mxu2 %vm280_vm0, %v1667_v7  ;;  %vm2997_vm7 = vcmp.le.f32.partialorder %v892_v33, 0.7853982  ;;  %vm894_vm13 = vcmp.lt.s32.totalorder %v2738_v38, 0 }
 0x163   : > { %2058 = vmatmul.msk.bf16.vlgmr.msrb.gmra.mxu3 %vm280_vm0, %v1047_v28  ;;  %v862_v35 = vsel %vm739_vm12, %v861_v58, %v2856_v22  ;;  %v877_v51 = vmul.f32 %v876_v44, %v2963_v61  ;;  %v1016_v17 = vsub.s32 4, %v2934_v53  ;;  %v869_v33 = vadd.f32 -0.4999988, %v868_v59 }
 0x164   : > { %v1005_v29 = vor.u32 %v1004_v0, %v1003_v19  ;;  %v1008_v45 = vshll.u32 %v1007_v46, 23  ;;  %v864_v55 = vsel %vm2944_vm15, 0, %v862_v35  ;;  %vm880_vm11 = vweird.f32 %v2642_v26 }
 0x165   : > { %v878_v36 = vadd.f32 1.0, %v877_v51  ;;  %v1017_v32 = vsel %vm894_vm13, %v1016_v17, %v2934_v53  ;;  %v870_v22 = vmul.f32 %v869_v33, %v2963_v61  ;;  %v881_v4 = vadd.s32 3, %v864_v55  ;;  %v1758_v51 = vpop.xlane.xlu0 %1757 }
 0x166   : > { %v1009_v47 = vor.u32 4788187, %v1008_v45  ;;  %v1012_v48 = vcvt.s32.f32 %v1005_v29  ;;  %v1019_v50 = vsel %vm2997_vm7, 0, %v1017_v32  ;;  %v1503_v21 = vand.u32 3, %v864_v55 }
 0x167   : > { %v879_v13 = vmul.f32 %v878_v36, %v2955_v49  ;;  %v871_v39 = vadd.f32 1.0, %v870_v22  ;;  %v1036_v15 = vadd.s32 3, %v1019_v50  ;;  %v1657_v53 = vand.u32 3, %v1019_v50 }
 0x168   : > { %v1010_v43 = vand.u32 2147483647, %v1009_v47  ;;  %v882_v52 = vand.u32 3, %v881_v4  ;;  %vm1504_vm12 = vcmp.lt.s32.totalorder %v1503_v21, 2  ;;  %vm1505_vm15 = vcmp.eq.s32.totalorder %v1503_v21, 0 }
 0x169   : > { %v885_v8 = vxor.u32 2147483648, %v879_v13  ;;  %v888_v19 = vxor.u32 2147483648, %v871_v39  ;;  %v1037_v10 = vand.u32 3, %v1036_v15  ;;  %vm1508_vm14 = vcmp.eq.s32.totalorder %v1503_v21, 2 }
 0x16a   : > { %v1013_v12 = vmul.f32 %v1012_v48, %v1010_v43  ;;  %vm1658_vm1 = vcmp.lt.s32.totalorder %v1657_v53, 2  ;;  %vm884_vm2 = vcmp.eq.s32.totalorder %v882_v52, 0  ;;  %vm1659_vm3 = vcmp.eq.s32.totalorder %v1657_v53, 0 }
 0x16b   : > { %v1507_v46 = vsel %vm1505_vm15, %v871_v39, %v885_v8  ;;  %v886_v40 = vsel %vm884_vm2, %v871_v39, %v885_v8  ;;  %vm1662_vm4 = vcmp.eq.s32.totalorder %v1657_v53, 2  ;;  %vm883_vm5 = vcmp.lt.s32.totalorder %v882_v52, 2 }
 0x16c   : > { %v1014_v1 = vxor.u32 2147483648, %v1013_v12  ;;  %vm887_vm6 = vcmp.eq.s32.totalorder %v882_v52, 2  ;;  %v1510_v20 = vsel %vm1508_vm14, %v888_v19, %v879_v13  ;;  %vm1038_vm9 = vcmp.lt.s32.totalorder %v1037_v10, 2 }
 0x16d   : > { %v889_v18 = vsel %vm887_vm6, %v888_v19, %v879_v13  ;;  %v1511_v57 = vsel %vm1504_vm12, %v1507_v46, %v1510_v20  ;;  %vm1039_vm8 = vcmp.eq.s32.totalorder %v1037_v10, 0  ;;  %vm1042_vm10 = vcmp.eq.s32.totalorder %v1037_v10, 2  ;;  %v1761_v33 = vpop.xlane.xlu0 %1760 }
 0x16e   : > { %v1015_v34 = vsel %vm894_vm13, %v1014_v1, %v1013_v12  ;;  %v890_v25 = vsel %vm883_vm5, %v886_v40, %v889_v18  ;;  %v1512_v43 = vsel %vm880_vm11, nan, %v1511_v57  ;;  %v1804_v13 = vmul.f32 %v1758_v51, %v2529_v14  ;;  %v2171_v18 = vld [vmem:[#allocation7 + $0x18] ss:$0 sm:$0xff] }
 0x16f   : > { %v1018_v37 = vsel %vm2997_vm7, %v2738_v38, %v1015_v34  ;;  %vm1035_vm7 = vweird.f32 %v2738_v38  ;;  %v891_v42 = vsel %vm880_vm11, nan, %v890_v25  ;;  %v1770_v34 = vpop.xlane.xlu1 %1769 }
 0x170   : > { %v1020_v6 = vmul.f32 %v1018_v37, %v1018_v37  ;;  %v1808_v46 = vmul.f32 %v1770_v34, %v2529_v14 }
 0x172   : > { %v1021_v63 = vmul.f32 -0.001358992, %v1020_v6  ;;  %v1028_v9 = vmul.f32 -0.00019511016, %v1020_v6 }
 0x174   : > { %v1022_v62 = vadd.f32 0.041655596, %v1021_v63  ;;  %v1029_v60 = vadd.f32 0.008332121, %v1028_v9  ;;  %v1764_v63 = vpop.xlane.xlu2 %1763 }
 0x175   : > { %v1767_v9 = vpop.xlane.xlu0 %1766 }
 0x176   : > { %v1023_v3 = vmul.f32 %v1022_v62, %v1020_v6  ;;  %v1030_v41 = vmul.f32 %v1029_v60, %v1020_v6  ;;  %v1805_v62 = vmul.f32 %v1761_v33, %v2531_v16 }
 0x178   : > { %v1024_v24 = vadd.f32 -0.4999988, %v1023_v3  ;;  %v1031_v31 = vadd.f32 -0.16666654, %v1030_v41  ;;  %v1820_v3 = vadd.f32 %v1805_v62, %v1804_v13 }
 0x17a   : > { %v1025_v27 = vmul.f32 %v1024_v24, %v1020_v6  ;;  %v1032_v61 = vmul.f32 %v1031_v31, %v1020_v6  ;;  %v1806_v24 = vmul.f32 %v1764_v63, %v2539_v23  ;;  %v1807_v31 = vmul.f32 %v1767_v9, %v2550_v30 }
 0x17c   : > { %v1026_v2 = vadd.f32 1.0, %v1025_v27  ;;  %v1033_v56 = vadd.f32 1.0, %v1032_v61  ;;  %v1782_v15 = vpop.xlane.xlu2 %1781  ;;  %v1821_v8 = vadd.f32 %v1820_v3, %v1806_v24 }
 0x17e   : > { %v1034_v49 = vmul.f32 %v1033_v56, %v1018_v37  ;;  %v1043_v0 = vxor.u32 2147483648, %v1026_v2  ;;  %v1773_v37 = vpop.xlane.xlu1 %1772  ;;  %v1822_v56 = vadd.f32 %v1821_v8, %v1807_v31 }
 0x17f   : > { %v1809_v10 = vmul.f32 %v1773_v37, %v2531_v16 }
 0x180   : > { %v1040_v5 = vxor.u32 2147483648, %v1034_v49  ;;  %v1664_v45 = vsel %vm1662_vm4, %v1043_v0, %v1034_v49  ;;  %v1044_v28 = vsel %vm1042_vm10, %v1043_v0, %v1034_v49 }
 0x181   : > { %v1823_v57 = vadd.f32 %v1809_v10, %v1808_v46 }
 0x182   : > { %v1661_v29 = vsel %vm1659_vm3, %v1026_v2, %v1040_v5  ;;  %v1041_v7 = vsel %vm1039_vm8, %v1026_v2, %v1040_v5  ;;  %v1776_v2 = vpop.xlane.xlu0 %1775 }
 0x183   : > { %v1665_v47 = vsel %vm1658_vm1, %v1661_v29, %v1664_v45  ;;  %v1045_v54 = vsel %vm1038_vm9, %v1041_v7, %v1044_v28  ;;  %v1810_v40 = vmul.f32 %v1776_v2, %v2539_v23 }
 0x184   : > { %v1666_v48 = vsel %vm1035_vm7, nan, %v1665_v47  ;;  %v1046_v12 = vsel %vm1035_vm7, nan, %v1045_v54  ;;  %v1785_v47 = vpop.xlane.xlu2 %1784 }
 0x185   : > { %v1668_v58 = vpack.c.bf16 %v1666_v48, %v1512_v43  ;;  %v1048_v44 = vpack.c.bf16 %v1046_v12, %v891_v42  ;;  %v1824_v28 = vadd.f32 %v1823_v57, %v1810_v40 }
 0x186   : > { %v1788_v36 = vpop.xlane.xlu1 %1787 }
 0x187   : > { %2053 = vmatmul.msk.bf16.gmra.mxu2 %vm280_vm0, %v1668_v58  ;;  %2059 = vmatmul.msk.bf16.gmra.mxu3 %vm280_vm0, %v1048_v44  ;;  %vm1850_vm0 = vcmask 261120   ;;  %v1814_v37 = vmul.f32 %v1788_v36, %v2539_v23 }
 0x18a   : > { %v1794_v34 = vpop.xlane.xlu0 %1793 }
 0x18e   : > { %v1797_v4 = vpop.xlane.xlu1 %1796 }
 0x196   : > { %v1779_v0 = vpop.xlane.xlu1 %1778 }
 0x197   : > { %v1811_v25 = vmul.f32 %v1779_v0, %v2550_v30 }
 0x199   : > { %v1825_v48 = vadd.f32 %v1824_v28, %v1811_v25 }
 0x1a8   : > { %v296_v1 = vpop.f32.mrf.mxu0 }
 0x1af   : > { %v334_v38 = vpop.f32.mrf.mxu2 }
 0x1b0   : > { %v298_v59 = vpop.f32.mrf.mxu0 }
 0x1b7   : > { %v336_v17 = vpop.f32.mrf.mxu2 }
 0x1b8   : > { %v3023_v11 = vpop.f32.mrf.mxu0 }
 0x1bf   : > { %v339_v55 = vpop.f32.mrf.mxu2 }
 0x1c0   : > { %v3025_v26 = vpop.f32.mrf.mxu0 }
 0x1c7   : > { %v341_v22 = vpop.f32.mrf.mxu2 }
 0x1c8   : > { %v372_v35 = vpop.f32.mrf.mxu0 }
 0x1c9   : > { %v1733_v60 = vmul.f32 %v372_v35, %v334_v38  ;;  %v1813_v38 = vmul.f32 %v1785_v47, %v2531_v16  ;;  %v1812_v35 = vmul.f32 %v1782_v15, %v2529_v14 }
 0x1d0   : > { %v374_v6 = vpop.f32.mrf.mxu0 }
 0x1d1   : > { %v1734_v50 = vmul.f32 %v374_v6, %v336_v17  ;;  %v1826_v17 = vadd.f32 %v1813_v38, %v1812_v35 }
 0x1d3   : > { %v1737_v41 = vadd.f32 %v1734_v50, %v1733_v60  ;;  %v1827_v63 = vadd.f32 %v1826_v17, %v1814_v37  ;;  %v1803_v60 = vpop.xlane.xlu0 %1802 }
 0x1d4   : > { %v1819_v3 = vmul.f32 %v1803_v60, %v2550_v30 }
 0x1d8   : > { %v377_v32 = vpop.f32.mrf.mxu0 }
 0x1d9   : > { %v1735_v21 = vmul.f32 %v377_v32, %v339_v55  ;;  %v1817_v55 = vmul.f32 %v1797_v4, %v2531_v16  ;;  %v1816_v32 = vmul.f32 %v1794_v34, %v2529_v14 }
 0x1db   : > { %v1738_v27 = vadd.f32 %v1737_v41, %v1735_v21  ;;  %v1829_v50 = vadd.f32 %v1817_v55, %v1816_v32 }
 0x1e0   : > { %v379_v39 = vpop.f32.mrf.mxu0 }
 0x1e1   : > { %v1736_v61 = vmul.f32 %v379_v39, %v341_v22 }
 0x1e3   : > { %v1739_v5 = vadd.f32 %v1738_v27, %v1736_v61 }
 0x1e5   : > { %v1692_v53 = vpop.f32.mrf.mxu2 }
 0x1e6   : > { %v1723_v52 = vpop.f32.mrf.mxu3 }
 0x1e7   : > { %v1724_v19 = vadd.f32 %v1723_v52, %v1692_v53 }
 0x1e9   : > { %v1832_v49 = vadd.f32 %v1724_v19, %v296_v1  ;;  %v1800_v1 = vpop.xlane.xlu2 %1799 }
 0x1ea   : > { %v1818_v36 = vmul.f32 %v1800_v1, %v2539_v23 }
 0x1eb   : > { %v1836_v20 = vadd.f32 %v1832_v49, %v1822_v56 }
 0x1ec   : > { %v1830_v14 = vadd.f32 %v1829_v50, %v1818_v36 }
 0x1ed   : > { %v1840_v29 = vadd.f32 %v1836_v20, %v1739_v5  ;;  %v1694_v45 = vpop.f32.mrf.mxu2 }
 0x1ee   : > { %v1725_v7 = vpop.f32.mrf.mxu3 }
 0x1ef   : > { %v1846_v54 = vadd.f32 %v2171_v18, %v1840_v29  ;;  %v1726_v43 = vadd.f32 %v1725_v7, %v1694_v45 }
 0x1f1   : > { %1851 = vst.msk [vmem:[%s3037_s20] sm:$0xff] %vm1850_vm0, %v1846_v54  ;;  %v1833_v42 = vadd.f32 %v1726_v43, %v298_v59  ;;  %v1791_v51 = vpop.xlane.xlu2 %1790 }
 0x1f2   : > { %v1815_v6 = vmul.f32 %v1791_v51, %v2550_v30 }
 0x1f3   : > { %v1837_v12 = vadd.f32 %v1833_v42, %v1825_v48 }
 0x1f4   : > { %v1828_v22 = vadd.f32 %v1827_v63, %v1815_v6 }
 0x1f5   : > { %v1841_v58 = vadd.f32 %v1837_v12, %v1739_v5 }
 0x1f7   : > { %v1847_v44 = vadd.f32 %v2171_v18, %v1841_v58 }
 0x1f9   : > { %1852 = vst.msk [vmem:[%s3037_s20 + $0x8] sm:$0xff] %vm1850_vm0, %v1847_v44 }
 0x20a   : > { %v1697_v33 = vpop.f32.mrf.mxu2  ;;  %v1728_v59 = vpop.f32.mrf.mxu3 }
 0x20b   : > { %v1729_v9 = vadd.f32 %v1728_v59, %v1697_v33 }
 0x20d   : > { %v1834_v62 = vadd.f32 %v1729_v9, %v3023_v11  ;;  %v1831_v11 = vadd.f32 %v1830_v14, %v1819_v3 }
 0x20f   : > { %v1838_v13 = vadd.f32 %v1834_v62, %v1828_v22 }
 0x211   : > { %v1842_v41 = vadd.f32 %v1838_v13, %v1739_v5 }
 0x212   : > { %v1699_v21 = vpop.f32.mrf.mxu2  ;;  %v1730_v16 = vpop.f32.mrf.mxu3 }
 0x213   : > { %v1848_v4 = vadd.f32 %v2171_v18, %v1842_v41  ;;  %v1731_v39 = vadd.f32 %v1730_v16, %v1699_v21 }
 0x215   : > { %1853 = vst.msk [vmem:[%s3037_s20 + $0x10] sm:$0xff] %vm1850_vm0, %v1848_v4  ;;  %v1835_v23 = vadd.f32 %v1731_v39, %v3025_v26 }
 0x217   : > { %v1839_v30 = vadd.f32 %v1835_v23, %v1831_v11 }
 0x219   : > { %v1843_v24 = vadd.f32 %v1839_v30, %v1739_v5 }
 0x21b   : > { %v1849_v31 = vadd.f32 %v2171_v18, %v1843_v24 }
 0x21d   : > { %1854 = vst.msk [vmem:[%s3037_s20 + $0x18] sm:$0xff] %vm1850_vm0, %v1849_v31 }
 0x21e   : > { %2289 = shalt.err (!%p2286_p0)
}
 0x21f   : > { %s2363_s19 = smov 128   ;;  %s2364_s27 = smov 8  }
 0x220   : > { %2084 = dma.vmem_to_hbm [thread:$0]  (%p2464_p2), %s1870_s25, 512, %s1872_s15, %s1856_s29, %s2363_s19, %s2363_s19, %s2364_s27  }
 0x221 PF: > { %s1886_s18 = sand.u32 1, %s2328_s12   ;;  %p2098_p4 = pnand %p1981_p10, %p2432_p5 }
 0x222   : > { %s1887_s20 = scalar_lea.sflag [#allocation4], %s1886_s18 }
 0x223   : > { %p2099_p6 = pneg %p2098_p4 }
 0x225   : > { %2323 = dma.done.wait (%p2099_p6), %s1887_s20, 512  }
 0x226   : > { %2325 = vsyncadd (%p2099_p6), %s1887_s20, 4294966784  ;;  %s20_s17 = sadd.s32 1, %s2348_s17   ;;  %s3113_s12 = smov %s2332_s13 }
 0x227   : > { %p17_p8 = scmp.ge.s32.totalorder %s20_s17, 4   ;;  %s3114_s13 = smov %s2336_s14 }
 0x228   : > { %s3115_s14 = smov %s2474_s28  ;;  %s3116_s15 = smov %s2344_s16 }
 0x229   : > { %s3117_s16 = smov %s3119_s11  ;;  %19 = sbr.rel (!%p17_p8) target bundleno = 7 (0x7), region = 85 }
 0x22e   :  { %1893 = vsyncpa [#allocation3], 1 }
 0x22f   :  { %1895 = vsyncpa [#allocation3 + $0x1], 1 }
 0x230   :  { %1896 = vsyncpa [#allocation6], 1 }
 0x231   :  { %1897 = vsyncpa [#allocation4], 1 }
 0x232   :  { %1899 = vsyncpa [#allocation4 + $0x1], 1 }

</bundles_post_ra>
